<compile_context>
chip_gen: v7x
topology: tpu7x:2x2x1
jax: 0.10.0
libtpu: 0.0.40
codegen_flags: <defaults>
</compile_context>

<pallas_src>
import functools
import math

import jax
import jax.numpy as jnp
from jax.experimental import pallas as pl
from jax.experimental.pallas import tpu as pltpu


def _round_up(x, m):
    return (x + m - 1) // m * m


def _interp_matrix(out_size, in_size):
    """Row-stochastic 1-D bilinear interpolation matrix, align_corners=True."""
    f32 = jnp.float32
    if in_size == 1 or out_size == 1:       # degenerate: everything maps to src 0
        return jnp.zeros((out_size, in_size), f32).at[:, 0].set(1.0)
    s = jnp.arange(out_size, dtype=f32) * ((in_size - 1) / (out_size - 1))
    lo = jnp.clip(jnp.floor(s).astype(jnp.int32), 0, in_size - 1)
    hi = jnp.minimum(lo + 1, in_size - 1)
    fr = s - lo.astype(f32)
    return ((1.0 - fr)[:, None] * jax.nn.one_hot(lo, in_size, dtype=f32)
            + fr[:, None] * jax.nn.one_hot(hi, in_size, dtype=f32))


def _interp_coeffs(out_size, in_size):
    """Static (lo, hi, frac) per output index, align_corners=True (Python scalars)."""
    scale = (in_size - 1) / (out_size - 1) if out_size > 1 else 0.0
    coeffs = []
    for o in range(out_size):
        s = o * scale
        lo = min(int(math.floor(s)), in_size - 1)
        hi = min(lo + 1, in_size - 1)
        coeffs.append((lo, hi, float(s - lo)))
    return tuple(coeffs)


def _pack_conv1_weights(w_oihw, c1, c2, c1_p, cin_p, cout_p):
    """OIHW (Cout, C1+C2, 3, 3) -> (9, cout_p, cin_p) bf16, tap-major.

    Skip-connection channels land in columns [0, C1); upsampled channels land
    in columns [c1_p, c1_p + C2) (8-sublane aligned); everything else is zero.
    """
    cout = w_oihw.shape[0]
    wk = jnp.transpose(w_oihw, (2, 3, 0, 1)).reshape(9, cout, c1 + c2)
    out = jnp.zeros((9, cout_p, cin_p), jnp.float32)
    out = out.at[:, :cout, :c1].set(wk[:, :, :c1].astype(jnp.float32))
    out = out.at[:, :cout, c1_p:c1_p + c2].set(wk[:, :, c1:].astype(jnp.float32))
    return out.astype(jnp.bfloat16)


def _pack_conv2_weights(w_oihw, cout_p):
    """OIHW (Cout, Cout, 3, 3) -> (9, cout_p, cout_p) bf16, tap-major."""
    cout, cin = w_oihw.shape[:2]
    wk = jnp.transpose(w_oihw, (2, 3, 0, 1)).reshape(9, cout, cin)
    out = jnp.zeros((9, cout_p, cout_p), jnp.float32)
    out = out.at[:, :cout, :cin].set(wk.astype(jnp.float32))
    return out.astype(jnp.bfloat16)


def _unet_up_kernel(x1_ref, x2_ref, uxT_ref, mask_ref,
                    w1_ref, b1_ref, w2_ref, b2_ref,
                    o_ref, feat_ref, *,
                    H, W, Hh, Wh, Wp, PF, C1, C2, c1_p, Cout,
                    roll_shifts, h_blend):
    """Fused upsample + concat + (conv3x3 + ReLU) x2 for one batch element.

    x1_ref  : (1, C1, H*W)        skip connection (flattened NCHW)
    x2_ref  : (1, C2, Hh*Wh)      low-res feature map (flattened NCHW)
    uxT_ref : (Wh, W)             1-D bilinear matrix (W direction), transposed
    mask_ref: (1, PF)             1.0 on interior pixels of the padded flat grid
    w1_ref  : (9, cout_p, cin1_p) conv1 weights, tap-major, bf16
    w2_ref  : (9, cout_p, cout_p) conv2 weights, tap-major, bf16
    b*_ref  : (cout_p, 1)         f32 biases (zero-padded)
    o_ref   : (1, Cout, H*W)
    feat_ref: (cin1_p, PF)        VMEM scratch: zero-padded flattened grid
    """
    f32, bf16 = jnp.float32, jnp.bfloat16

    # 0) Zero the padded-grid scratch EVERY grid step: halo ring, lane tail and
    #    padded channel rows must be exactly 0 for "padding=1" conv semantics.
    feat_ref[...] = jnp.zeros_like(feat_ref)

    # 1) Scatter the skip connection rows into the padded grid (static copies).
    x1 = x1_ref[0].astype(f32)                                     # (C1, H*W)
    for y in range(H):
        dst = (y + 1) * Wp + 1
        feat_ref[0:C1, dst:dst + W] = x1[:, y * W:(y + 1) * W]

    # 2) Separable bilinear x2 upsample (align_corners=True), fused with the
    #    scatter onto rows [c1_p, c1_p + C2) of the padded grid.
    x2 = x2_ref[0].astype(f32)                                     # (C2, Hh*Wh)
    uxT = uxT_ref[...]                                             # (Wh, W)
    wide = [jnp.dot(x2[:, h * Wh:(h + 1) * Wh], uxT,
                    preferred_element_type=f32)
            for h in range(Hh)]                                    # Hh x (C2, W)
    for y, (h0, h1, fy) in enumerate(h_blend):
        row = wide[h0] if fy == 0.0 else (1.0 - fy) * wide[h0] + fy * wide[h1]
        dst = (y + 1) * Wp + 1
        feat_ref[c1_p:c1_p + C2, dst:dst + W] = row

    mask = mask_ref[...]                                           # (1, PF)

    # 3) conv3x3 as 9 per-tap MXU matmuls over rolled copies of the padded
    #    grid (no im2col buffer).  bf16 operands, f32 accumulation.
    def conv3x3_relu(inp32, w_taps_ref, b):
        acc = None
        for k, sh in enumerate(roll_shifts):
            tap = inp32 if sh == 0 else pltpu.roll(inp32, shift=sh, axis=1)
            part = jnp.dot(w_taps_ref[k], tap.astype(bf16),
                           preferred_element_type=f32)
            acc = part if acc is None else acc + part
        return jnp.maximum(acc + b, 0.0)

    feat = feat_ref[...]                                           # (cin1_p, PF)
    # mask multiply is load-bearing: it re-zeroes halo/tail lanes (relu(bias)
    # and roll wrap-around garbage) so conv2 sees correct zero padding.
    act1 = conv3x3_relu(feat, w1_ref, b1_ref[...]) * mask          # (cout_p, PF)
    act2 = conv3x3_relu(act1, w2_ref, b2_ref[...])                 # (cout_p, PF)

    # 4) Gather interior pixels back to the dense (Cout, H*W) output block.
    for y in range(H):
        src = (y + 1) * Wp + 1
        o_ref[0, :, y * W:(y + 1) * W] = act2[:Cout, src:src + W].astype(o_ref.dtype)


def unet_up_forward(inputs1, inputs2, w1, b1, w2, b2):
    """unetUp.forward.  inputs1/inputs2/output are NCHW; w* OIHW; b* (Cout,)."""
    f32 = jnp.float32
    N, C1, H, W = inputs1.shape
    N2, C2, Hh, Wh = inputs2.shape
    assert N == N2 and H == 2 * Hh and W == 2 * Wh
    Cout, Cin = w1.shape[0], w1.shape[1]
    assert Cin == C1 + C2 and w2.shape[0] == Cout and w2.shape[1] == Cout

    HW, HhWh = H * W, Hh * Wh
    Wp = W + 2
    PF = _round_up((H + 2) * Wp, 128)           # lane-aligned padded flat grid
    c1_p = _round_up(C1, 8)                     # 8-sublane-aligned skip block
    cin1_p = _round_up(c1_p + C2, 8)            # conv1 input rows
    cout_p = _round_up(Cout, 8)                 # conv1/2 output rows

    # ---- tiny constants (1-D bilinear matrix, interior mask, packed weights) ----
    uxT = _interp_matrix(W, Wh).T.astype(f32)                      # (Wh, W)
    h_blend = _interp_coeffs(H, Hh)                                # python scalars

    yy, xx = jnp.meshgrid(jnp.arange(H), jnp.arange(W), indexing="ij")
    q = ((yy + 1) * Wp + (xx + 1)).reshape(-1)
    mask = jnp.zeros((1, PF), f32).at[0, q].set(1.0)               # (1, PF)

    w1p = _pack_conv1_weights(w1, C1, C2, c1_p, cin1_p, cout_p)    # (9,cout_p,cin1_p) bf16
    w2p = _pack_conv2_weights(w2, cout_p)                          # (9,cout_p,cout_p) bf16
    b1p = jnp.zeros((cout_p, 1), f32).at[:Cout, 0].set(b1.astype(f32))
    b2p = jnp.zeros((cout_p, 1), f32).at[:Cout, 0].set(b2.astype(f32))

    x1 = inputs1.reshape(N, C1, HW)             # free reshapes, no transpose
    x2 = inputs2.reshape(N, C2, HhWh)

    # Tap k = ky*3 + kx reads padded flat position p + s, s = (ky-1)*Wp + (kx-1);
    # roll by (-s) mod PF brings that value to lane p.
    roll_shifts = tuple((-((dy - 1) * Wp + (dx - 1))) % PF
                        for dy in range(3) for dx in range(3))

    kernel = functools.partial(
        _unet_up_kernel, H=H, W=W, Hh=Hh, Wh=Wh, Wp=Wp, PF=PF,
        C1=C1, C2=C2, c1_p=c1_p, Cout=Cout,
        roll_shifts=roll_shifts, h_blend=h_blend)

    const = lambda shape: pl.BlockSpec(shape, lambda n, s=shape: (0,) * len(s))

    out_flat = pl.pallas_call(
        kernel,
        out_shape=jax.ShapeDtypeStruct((N, Cout, HW), inputs1.dtype),
        grid=(N,),
        in_specs=[
            pl.BlockSpec((1, C1, HW), lambda n: (n, 0, 0)),
            pl.BlockSpec((1, C2, HhWh), lambda n: (n, 0, 0)),
            const((Wh, W)),
            const((1, PF)),
            const((9, cout_p, cin1_p)),
            const((cout_p, 1)),
            const((9, cout_p, cout_p)),
            const((cout_p, 1)),
        ],
        out_specs=pl.BlockSpec((1, Cout, HW), lambda n: (n, 0, 0)),
        scratch_shapes=[pltpu.VMEM((cin1_p, PF), f32)],
        compiler_params=pltpu.CompilerParams(
            dimension_semantics=("parallel",)),   # v7x: shard batch over 2 TCs
    )(x1, x2, uxT, mask, w1p, b1p, w2p, b2p)

    return out_flat.reshape(N, Cout, H, W)        # free reshape -> NCHW


def _reference(inputs1, inputs2, w1, b1, w2, b2):
    """Pure-JAX reference of the PyTorch module (for a sanity check)."""
    _, _, hh, wh = inputs2.shape
    H, W = 2 * hh, 2 * wh

    def coords(o, i):
        s = jnp.arange(o, dtype=jnp.float32) * (i - 1) / (o - 1)
        lo = jnp.floor(s).astype(jnp.int32)
        hi = jnp.minimum(lo + 1, i - 1)
        return lo, hi, s - lo.astype(jnp.float32)

    y0, y1, fy = coords(H, hh)
    x0, x1, fx = coords(W, wh)
    rows = (inputs2[:, :, y0, :] * (1.0 - fy)[None, None, :, None]
            + inputs2[:, :, y1, :] * fy[None, None, :, None])
    up = (rows[:, :, :, x0] * (1.0 - fx)[None, None, None, :]
          + rows[:, :, :, x1] * fx[None, None, None, :])
    cat = jnp.concatenate([inputs1, up], axis=1)

    def conv(x, w, b):
        y = jax.lax.conv_general_dilated(
            x, w, window_strides=(1, 1), padding=((1, 1), (1, 1)),
            dimension_numbers=("NCHW", "OIHW", "NCHW"))
        return jax.nn.relu(y + b[None, :, None, None])

    return conv(conv(cat, w1, b1), w2, b2)


if __name__ == "__main__":
    # Module config: unetUp(in_size=8, out_size=4)
    in_size, out_size = 8, 4
    N, H, W = 2, 16, 16
    c1 = out_size                 # skip-connection channels
    c2 = in_size - out_size       # low-res feature-map channels

    key = jax.random.PRNGKey(0)
    k1, k2, k3, k4, k5, k6 = jax.random.split(key, 6)
    inputs1 = jax.random.normal(k1, (N, c1, H, W), jnp.float32)            # NCHW
    inputs2 = jax.random.normal(k2, (N, c2, H // 2, W // 2), jnp.float32)  # NCHW

    # Deterministic synthetic parameters (OIHW weights, (Cout,) bias).
    w1 = 0.1 * jax.random.normal(k3, (out_size, in_size, 3, 3), jnp.float32)
    b1 = 0.1 * jax.random.normal(k4, (out_size,), jnp.float32)
    w2 = 0.1 * jax.random.normal(k5, (out_size, out_size, 3, 3), jnp.float32)
    b2 = 0.1 * jax.random.normal(k6, (out_size,), jnp.float32)

    out = jax.jit(unet_up_forward)(inputs1, inputs2, w1, b1, w2, b2)
    jax.block_until_ready(out)
    assert out.shape == (N, out_size, H, W), out.shape

    # Sanity check against a plain-JAX f32 reference.  Tolerance covers the
    # bf16 MXU operands (f32 accumulation) used inside the kernel.
    ref = _reference(inputs1, inputs2, w1, b1, w2, b2)
    err = jnp.max(jnp.abs(out - ref))
    assert err < 5e-2, f"max abs err {err}"
    print("KERNEL_OK")
</pallas_src>

<mosaic_0001>
module attributes {stable_mosaic.version = 11 : i64} {
  func.func @_unet_up_kernel(%arg0: i32, %arg1: memref<1x4x256xf32, #tpu.memory_space<vmem>>, %arg2: memref<1x4x64xf32, #tpu.memory_space<vmem>>, %arg3: memref<8x16xf32, #tpu.memory_space<vmem>>, %arg4: memref<1x384xf32, #tpu.memory_space<vmem>>, %arg5: memref<9x8x16xbf16, #tpu.memory_space<vmem>>, %arg6: memref<8x1xf32, #tpu.memory_space<vmem>>, %arg7: memref<9x8x8xbf16, #tpu.memory_space<vmem>>, %arg8: memref<8x1xf32, #tpu.memory_space<vmem>>, %arg9: memref<1x4x256xf32, #tpu.memory_space<vmem>>, %arg10: memref<16x384xf32, #tpu.memory_space<vmem>>) attributes {dimension_semantics = [#tpu.dimension_semantics<parallel>], iteration_bounds = array<i64: 2>, scalar_prefetch = 0 : i64, scratch_operands = 1 : i64, tpu.core_type = #tpu.core_type<tc>, window_params = [{transform_indices = @transform_0, window_bounds = array<i64: 1, 4, 256>}, {transform_indices = @transform_1, window_bounds = array<i64: 1, 4, 64>}, {pipeline_mode = #tpu.pipeline_mode<synchronous>, transform_indices = @transform_2, window_bounds = array<i64: 8, 16>}, {pipeline_mode = #tpu.pipeline_mode<synchronous>, transform_indices = @transform_3, window_bounds = array<i64: 1, 384>}, {pipeline_mode = #tpu.pipeline_mode<synchronous>, transform_indices = @transform_4, window_bounds = array<i64: 9, 8, 16>}, {pipeline_mode = #tpu.pipeline_mode<synchronous>, transform_indices = @transform_5, window_bounds = array<i64: 8, 1>}, {pipeline_mode = #tpu.pipeline_mode<synchronous>, transform_indices = @transform_6, window_bounds = array<i64: 9, 8, 8>}, {pipeline_mode = #tpu.pipeline_mode<synchronous>, transform_indices = @transform_7, window_bounds = array<i64: 8, 1>}, {transform_indices = @transform_8, window_bounds = array<i64: 1, 4, 256>}]} {
    %cst = arith.constant 0.000000e+00 : f32
    %0 = vector.broadcast %cst : f32 to vector<16x384xf32>
    %c0 = arith.constant 0 : index
    %c0_0 = arith.constant 0 : index
    %1 = vector.load %arg10[%c0, %c0_0] : memref<16x384xf32, #tpu.memory_space<vmem>>, vector<16x384xf32>
    tpu.vector_store %arg10[%c0, %c0_0], %0 {strides = array<i32>} : memref<16x384xf32, #tpu.memory_space<vmem>>, vector<16x384xf32>,
    %c0_1 = arith.constant 0 : index
    %c0_2 = arith.constant 0 : index
    %c0_3 = arith.constant 0 : index
    %2 = vector.load %arg1[%c0_1, %c0_2, %c0_3] : memref<1x4x256xf32, #tpu.memory_space<vmem>>, vector<1x4x256xf32>
    %3 = vector.shape_cast %2 : vector<1x4x256xf32> to vector<4x256xf32>
    %4 = vector.extract_strided_slice %3 {offsets = [0, 0], sizes = [4, 16], strides = [1, 1]} : vector<4x256xf32> to vector<4x16xf32>
    %c0_4 = arith.constant 0 : index
    %c19 = arith.constant 19 : index
    %5 = vector.load %arg10[%c0_4, %c19] : memref<16x384xf32, #tpu.memory_space<vmem>>, vector<4x16xf32>
    tpu.vector_store %arg10[%c0_4, %c19], %4 {strides = array<i32>} : memref<16x384xf32, #tpu.memory_space<vmem>>, vector<4x16xf32>,
    %6 = vector.extract_strided_slice %3 {offsets = [0, 16], sizes = [4, 16], strides = [1, 1]} : vector<4x256xf32> to vector<4x16xf32>
    %c0_5 = arith.constant 0 : index
    %c37 = arith.constant 37 : index
    %7 = vector.load %arg10[%c0_5, %c37] : memref<16x384xf32, #tpu.memory_space<vmem>>, vector<4x16xf32>
    tpu.vector_store %arg10[%c0_5, %c37], %6 {strides = array<i32>} : memref<16x384xf32, #tpu.memory_space<vmem>>, vector<4x16xf32>,
    %8 = vector.extract_strided_slice %3 {offsets = [0, 32], sizes = [4, 16], strides = [1, 1]} : vector<4x256xf32> to vector<4x16xf32>
    %c0_6 = arith.constant 0 : index
    %c55 = arith.constant 55 : index
    %9 = vector.load %arg10[%c0_6, %c55] : memref<16x384xf32, #tpu.memory_space<vmem>>, vector<4x16xf32>
    tpu.vector_store %arg10[%c0_6, %c55], %8 {strides = array<i32>} : memref<16x384xf32, #tpu.memory_space<vmem>>, vector<4x16xf32>,
    %10 = vector.extract_strided_slice %3 {offsets = [0, 48], sizes = [4, 16], strides = [1, 1]} : vector<4x256xf32> to vector<4x16xf32>
    %c0_7 = arith.constant 0 : index
    %c73 = arith.constant 73 : index
    %11 = vector.load %arg10[%c0_7, %c73] : memref<16x384xf32, #tpu.memory_space<vmem>>, vector<4x16xf32>
    tpu.vector_store %arg10[%c0_7, %c73], %10 {strides = array<i32>} : memref<16x384xf32, #tpu.memory_space<vmem>>, vector<4x16xf32>,
    %12 = vector.extract_strided_slice %3 {offsets = [0, 64], sizes = [4, 16], strides = [1, 1]} : vector<4x256xf32> to vector<4x16xf32>
    %c0_8 = arith.constant 0 : index
    %c91 = arith.constant 91 : index
    %13 = vector.load %arg10[%c0_8, %c91] : memref<16x384xf32, #tpu.memory_space<vmem>>, vector<4x16xf32>
    tpu.vector_store %arg10[%c0_8, %c91], %12 {strides = array<i32>} : memref<16x384xf32, #tpu.memory_space<vmem>>, vector<4x16xf32>,
    %14 = vector.extract_strided_slice %3 {offsets = [0, 80], sizes = [4, 16], strides = [1, 1]} : vector<4x256xf32> to vector<4x16xf32>
    %c0_9 = arith.constant 0 : index
    %c109 = arith.constant 109 : index
    %15 = vector.load %arg10[%c0_9, %c109] : memref<16x384xf32, #tpu.memory_space<vmem>>, vector<4x16xf32>
    tpu.vector_store %arg10[%c0_9, %c109], %14 {strides = array<i32>} : memref<16x384xf32, #tpu.memory_space<vmem>>, vector<4x16xf32>,
    %16 = vector.extract_strided_slice %3 {offsets = [0, 96], sizes = [4, 16], strides = [1, 1]} : vector<4x256xf32> to vector<4x16xf32>
    %c0_10 = arith.constant 0 : index
    %c127 = arith.constant 127 : index
    %17 = vector.load %arg10[%c0_10, %c127] : memref<16x384xf32, #tpu.memory_space<vmem>>, vector<4x16xf32>
    tpu.vector_store %arg10[%c0_10, %c127], %16 {strides = array<i32>} : memref<16x384xf32, #tpu.memory_space<vmem>>, vector<4x16xf32>,
    %18 = vector.extract_strided_slice %3 {offsets = [0, 112], sizes = [4, 16], strides = [1, 1]} : vector<4x256xf32> to vector<4x16xf32>
    %c0_11 = arith.constant 0 : index
    %c145 = arith.constant 145 : index
    %19 = vector.load %arg10[%c0_11, %c145] : memref<16x384xf32, #tpu.memory_space<vmem>>, vector<4x16xf32>
    tpu.vector_store %arg10[%c0_11, %c145], %18 {strides = array<i32>} : memref<16x384xf32, #tpu.memory_space<vmem>>, vector<4x16xf32>,
    %20 = vector.extract_strided_slice %3 {offsets = [0, 128], sizes = [4, 16], strides = [1, 1]} : vector<4x256xf32> to vector<4x16xf32>
    %c0_12 = arith.constant 0 : index
    %c163 = arith.constant 163 : index
    %21 = vector.load %arg10[%c0_12, %c163] : memref<16x384xf32, #tpu.memory_space<vmem>>, vector<4x16xf32>
    tpu.vector_store %arg10[%c0_12, %c163], %20 {strides = array<i32>} : memref<16x384xf32, #tpu.memory_space<vmem>>, vector<4x16xf32>,
    %22 = vector.extract_strided_slice %3 {offsets = [0, 144], sizes = [4, 16], strides = [1, 1]} : vector<4x256xf32> to vector<4x16xf32>
    %c0_13 = arith.constant 0 : index
    %c181 = arith.constant 181 : index
    %23 = vector.load %arg10[%c0_13, %c181] : memref<16x384xf32, #tpu.memory_space<vmem>>, vector<4x16xf32>
    tpu.vector_store %arg10[%c0_13, %c181], %22 {strides = array<i32>} : memref<16x384xf32, #tpu.memory_space<vmem>>, vector<4x16xf32>,
    %24 = vector.extract_strided_slice %3 {offsets = [0, 160], sizes = [4, 16], strides = [1, 1]} : vector<4x256xf32> to vector<4x16xf32>
    %c0_14 = arith.constant 0 : index
    %c199 = arith.constant 199 : index
    %25 = vector.load %arg10[%c0_14, %c199] : memref<16x384xf32, #tpu.memory_space<vmem>>, vector<4x16xf32>
    tpu.vector_store %arg10[%c0_14, %c199], %24 {strides = array<i32>} : memref<16x384xf32, #tpu.memory_space<vmem>>, vector<4x16xf32>,
    %26 = vector.extract_strided_slice %3 {offsets = [0, 176], sizes = [4, 16], strides = [1, 1]} : vector<4x256xf32> to vector<4x16xf32>
    %c0_15 = arith.constant 0 : index
    %c217 = arith.constant 217 : index
    %27 = vector.load %arg10[%c0_15, %c217] : memref<16x384xf32, #tpu.memory_space<vmem>>, vector<4x16xf32>
    tpu.vector_store %arg10[%c0_15, %c217], %26 {strides = array<i32>} : memref<16x384xf32, #tpu.memory_space<vmem>>, vector<4x16xf32>,
    %28 = vector.extract_strided_slice %3 {offsets = [0, 192], sizes = [4, 16], strides = [1, 1]} : vector<4x256xf32> to vector<4x16xf32>
    %c0_16 = arith.constant 0 : index
    %c235 = arith.constant 235 : index
    %29 = vector.load %arg10[%c0_16, %c235] : memref<16x384xf32, #tpu.memory_space<vmem>>, vector<4x16xf32>
    tpu.vector_store %arg10[%c0_16, %c235], %28 {strides = array<i32>} : memref<16x384xf32, #tpu.memory_space<vmem>>, vector<4x16xf32>,
    %30 = vector.extract_strided_slice %3 {offsets = [0, 208], sizes = [4, 16], strides = [1, 1]} : vector<4x256xf32> to vector<4x16xf32>
    %c0_17 = arith.constant 0 : index
    %c253 = arith.constant 253 : index
    %31 = vector.load %arg10[%c0_17, %c253] : memref<16x384xf32, #tpu.memory_space<vmem>>, vector<4x16xf32>
    tpu.vector_store %arg10[%c0_17, %c253], %30 {strides = array<i32>} : memref<16x384xf32, #tpu.memory_space<vmem>>, vector<4x16xf32>,
    %32 = vector.extract_strided_slice %3 {offsets = [0, 224], sizes = [4, 16], strides = [1, 1]} : vector<4x256xf32> to vector<4x16xf32>
    %c0_18 = arith.constant 0 : index
    %c271 = arith.constant 271 : index
    %33 = vector.load %arg10[%c0_18, %c271] : memref<16x384xf32, #tpu.memory_space<vmem>>, vector<4x16xf32>
    tpu.vector_store %arg10[%c0_18, %c271], %32 {strides = array<i32>} : memref<16x384xf32, #tpu.memory_space<vmem>>, vector<4x16xf32>,
    %34 = vector.extract_strided_slice %3 {offsets = [0, 240], sizes = [4, 16], strides = [1, 1]} : vector<4x256xf32> to vector<4x16xf32>
    %c0_19 = arith.constant 0 : index
    %c289 = arith.constant 289 : index
    %35 = vector.load %arg10[%c0_19, %c289] : memref<16x384xf32, #tpu.memory_space<vmem>>, vector<4x16xf32>
    tpu.vector_store %arg10[%c0_19, %c289], %34 {strides = array<i32>} : memref<16x384xf32, #tpu.memory_space<vmem>>, vector<4x16xf32>,
    %c0_20 = arith.constant 0 : index
    %c0_21 = arith.constant 0 : index
    %c0_22 = arith.constant 0 : index
    %36 = vector.load %arg2[%c0_20, %c0_21, %c0_22] : memref<1x4x64xf32, #tpu.memory_space<vmem>>, vector<1x4x64xf32>
    %37 = vector.shape_cast %36 : vector<1x4x64xf32> to vector<4x64xf32>
    %c0_23 = arith.constant 0 : index
    %c0_24 = arith.constant 0 : index
    %38 = vector.load %arg3[%c0_23, %c0_24] : memref<8x16xf32, #tpu.memory_space<vmem>>, vector<8x16xf32>
    %39 = vector.extract_strided_slice %37 {offsets = [0, 0], sizes = [4, 8], strides = [1, 1]} : vector<4x64xf32> to vector<4x8xf32>
    %cst_25 = arith.constant dense<0.000000e+00> : vector<4x16xf32>
    %40 = tpu.matmul %39, %38, %cst_25 {dimension_numbers = #tpu.dot_dimension_numbers<[1], [0], [0], [1], [0, 0, 1, 1], [], []>} : vector<4x8xf32>, vector<8x16xf32>, vector<4x16xf32> -> vector<4x16xf32>
    %41 = vector.extract_strided_slice %37 {offsets = [0, 8], sizes = [4, 8], strides = [1, 1]} : vector<4x64xf32> to vector<4x8xf32>
    %cst_26 = arith.constant dense<0.000000e+00> : vector<4x16xf32>
    %42 = tpu.matmul %41, %38, %cst_26 {dimension_numbers = #tpu.dot_dimension_numbers<[1], [0], [0], [1], [0, 0, 1, 1], [], []>} : vector<4x8xf32>, vector<8x16xf32>, vector<4x16xf32> -> vector<4x16xf32>
    %43 = vector.extract_strided_slice %37 {offsets = [0, 16], sizes = [4, 8], strides = [1, 1]} : vector<4x64xf32> to vector<4x8xf32>
    %cst_27 = arith.constant dense<0.000000e+00> : vector<4x16xf32>
    %44 = tpu.matmul %43, %38, %cst_27 {dimension_numbers = #tpu.dot_dimension_numbers<[1], [0], [0], [1], [0, 0, 1, 1], [], []>} : vector<4x8xf32>, vector<8x16xf32>, vector<4x16xf32> -> vector<4x16xf32>
    %45 = vector.extract_strided_slice %37 {offsets = [0, 24], sizes = [4, 8], strides = [1, 1]} : vector<4x64xf32> to vector<4x8xf32>
    %cst_28 = arith.constant dense<0.000000e+00> : vector<4x16xf32>
    %46 = tpu.matmul %45, %38, %cst_28 {dimension_numbers = #tpu.dot_dimension_numbers<[1], [0], [0], [1], [0, 0, 1, 1], [], []>} : vector<4x8xf32>, vector<8x16xf32>, vector<4x16xf32> -> vector<4x16xf32>
    %47 = vector.extract_strided_slice %37 {offsets = [0, 32], sizes = [4, 8], strides = [1, 1]} : vector<4x64xf32> to vector<4x8xf32>
    %cst_29 = arith.constant dense<0.000000e+00> : vector<4x16xf32>
    %48 = tpu.matmul %47, %38, %cst_29 {dimension_numbers = #tpu.dot_dimension_numbers<[1], [0], [0], [1], [0, 0, 1, 1], [], []>} : vector<4x8xf32>, vector<8x16xf32>, vector<4x16xf32> -> vector<4x16xf32>
    %49 = vector.extract_strided_slice %37 {offsets = [0, 40], sizes = [4, 8], strides = [1, 1]} : vector<4x64xf32> to vector<4x8xf32>
    %cst_30 = arith.constant dense<0.000000e+00> : vector<4x16xf32>
    %50 = tpu.matmul %49, %38, %cst_30 {dimension_numbers = #tpu.dot_dimension_numbers<[1], [0], [0], [1], [0, 0, 1, 1], [], []>} : vector<4x8xf32>, vector<8x16xf32>, vector<4x16xf32> -> vector<4x16xf32>
    %51 = vector.extract_strided_slice %37 {offsets = [0, 48], sizes = [4, 8], strides = [1, 1]} : vector<4x64xf32> to vector<4x8xf32>
    %cst_31 = arith.constant dense<0.000000e+00> : vector<4x16xf32>
    %52 = tpu.matmul %51, %38, %cst_31 {dimension_numbers = #tpu.dot_dimension_numbers<[1], [0], [0], [1], [0, 0, 1, 1], [], []>} : vector<4x8xf32>, vector<8x16xf32>, vector<4x16xf32> -> vector<4x16xf32>
    %53 = vector.extract_strided_slice %37 {offsets = [0, 56], sizes = [4, 8], strides = [1, 1]} : vector<4x64xf32> to vector<4x8xf32>
    %cst_32 = arith.constant dense<0.000000e+00> : vector<4x16xf32>
    %54 = tpu.matmul %53, %38, %cst_32 {dimension_numbers = #tpu.dot_dimension_numbers<[1], [0], [0], [1], [0, 0, 1, 1], [], []>} : vector<4x8xf32>, vector<8x16xf32>, vector<4x16xf32> -> vector<4x16xf32>
    %c8 = arith.constant 8 : index
    %c19_33 = arith.constant 19 : index
    %55 = vector.load %arg10[%c8, %c19_33] : memref<16x384xf32, #tpu.memory_space<vmem>>, vector<4x16xf32>
    tpu.vector_store %arg10[%c8, %c19_33], %40 {strides = array<i32>} : memref<16x384xf32, #tpu.memory_space<vmem>>, vector<4x16xf32>,
    %cst_34 = arith.constant 0.533333361 : f32
    %56 = vector.broadcast %cst_34 : f32 to vector<4x16xf32>
    %57 = arith.mulf %56, %40 : vector<4x16xf32>
    %cst_35 = arith.constant 0.466666669 : f32
    %58 = vector.broadcast %cst_35 : f32 to vector<4x16xf32>
    %59 = arith.mulf %58, %42 : vector<4x16xf32>
    %60 = arith.addf %57, %59 : vector<4x16xf32>
    %c8_36 = arith.constant 8 : index
    %c37_37 = arith.constant 37 : index
    %61 = vector.load %arg10[%c8_36, %c37_37] : memref<16x384xf32, #tpu.memory_space<vmem>>, vector<4x16xf32>
    tpu.vector_store %arg10[%c8_36, %c37_37], %60 {strides = array<i32>} : memref<16x384xf32, #tpu.memory_space<vmem>>, vector<4x16xf32>,
    %cst_38 = arith.constant 0.0666666701 : f32
    %62 = vector.broadcast %cst_38 : f32 to vector<4x16xf32>
    %63 = arith.mulf %62, %40 : vector<4x16xf32>
    %cst_39 = arith.constant 0.933333337 : f32
    %64 = vector.broadcast %cst_39 : f32 to vector<4x16xf32>
    %65 = arith.mulf %64, %42 : vector<4x16xf32>
    %66 = arith.addf %63, %65 : vector<4x16xf32>
    %c8_40 = arith.constant 8 : index
    %c55_41 = arith.constant 55 : index
    %67 = vector.load %arg10[%c8_40, %c55_41] : memref<16x384xf32, #tpu.memory_space<vmem>>, vector<4x16xf32>
    tpu.vector_store %arg10[%c8_40, %c55_41], %66 {strides = array<i32>} : memref<16x384xf32, #tpu.memory_space<vmem>>, vector<4x16xf32>,
    %cst_42 = arith.constant 6.000000e-01 : f32
    %68 = vector.broadcast %cst_42 : f32 to vector<4x16xf32>
    %69 = arith.mulf %68, %42 : vector<4x16xf32>
    %cst_43 = arith.constant 4.000000e-01 : f32
    %70 = vector.broadcast %cst_43 : f32 to vector<4x16xf32>
    %71 = arith.mulf %70, %44 : vector<4x16xf32>
    %72 = arith.addf %69, %71 : vector<4x16xf32>
    %c8_44 = arith.constant 8 : index
    %c73_45 = arith.constant 73 : index
    %73 = vector.load %arg10[%c8_44, %c73_45] : memref<16x384xf32, #tpu.memory_space<vmem>>, vector<4x16xf32>
    tpu.vector_store %arg10[%c8_44, %c73_45], %72 {strides = array<i32>} : memref<16x384xf32, #tpu.memory_space<vmem>>, vector<4x16xf32>,
    %cst_46 = arith.constant 0.13333334 : f32
    %74 = vector.broadcast %cst_46 : f32 to vector<4x16xf32>
    %75 = arith.mulf %74, %42 : vector<4x16xf32>
    %cst_47 = arith.constant 0.866666674 : f32
    %76 = vector.broadcast %cst_47 : f32 to vector<4x16xf32>
    %77 = arith.mulf %76, %44 : vector<4x16xf32>
    %78 = arith.addf %75, %77 : vector<4x16xf32>
    %c8_48 = arith.constant 8 : index
    %c91_49 = arith.constant 91 : index
    %79 = vector.load %arg10[%c8_48, %c91_49] : memref<16x384xf32, #tpu.memory_space<vmem>>, vector<4x16xf32>
    tpu.vector_store %arg10[%c8_48, %c91_49], %78 {strides = array<i32>} : memref<16x384xf32, #tpu.memory_space<vmem>>, vector<4x16xf32>,
    %cst_50 = arith.constant 0.666666686 : f32
    %80 = vector.broadcast %cst_50 : f32 to vector<4x16xf32>
    %81 = arith.mulf %80, %44 : vector<4x16xf32>
    %cst_51 = arith.constant 0.333333343 : f32
    %82 = vector.broadcast %cst_51 : f32 to vector<4x16xf32>
    %83 = arith.mulf %82, %46 : vector<4x16xf32>
    %84 = arith.addf %81, %83 : vector<4x16xf32>
    %c8_52 = arith.constant 8 : index
    %c109_53 = arith.constant 109 : index
    %85 = vector.load %arg10[%c8_52, %c109_53] : memref<16x384xf32, #tpu.memory_space<vmem>>, vector<4x16xf32>
    tpu.vector_store %arg10[%c8_52, %c109_53], %84 {strides = array<i32>} : memref<16x384xf32, #tpu.memory_space<vmem>>, vector<4x16xf32>,
    %cst_54 = arith.constant 2.000000e-01 : f32
    %86 = vector.broadcast %cst_54 : f32 to vector<4x16xf32>
    %87 = arith.mulf %86, %44 : vector<4x16xf32>
    %cst_55 = arith.constant 8.000000e-01 : f32
    %88 = vector.broadcast %cst_55 : f32 to vector<4x16xf32>
    %89 = arith.mulf %88, %46 : vector<4x16xf32>
    %90 = arith.addf %87, %89 : vector<4x16xf32>
    %c8_56 = arith.constant 8 : index
    %c127_57 = arith.constant 127 : index
    %91 = vector.load %arg10[%c8_56, %c127_57] : memref<16x384xf32, #tpu.memory_space<vmem>>, vector<4x16xf32>
    tpu.vector_store %arg10[%c8_56, %c127_57], %90 {strides = array<i32>} : memref<16x384xf32, #tpu.memory_space<vmem>>, vector<4x16xf32>,
    %cst_58 = arith.constant 0.733333349 : f32
    %92 = vector.broadcast %cst_58 : f32 to vector<4x16xf32>
    %93 = arith.mulf %92, %46 : vector<4x16xf32>
    %cst_59 = arith.constant 0.266666681 : f32
    %94 = vector.broadcast %cst_59 : f32 to vector<4x16xf32>
    %95 = arith.mulf %94, %48 : vector<4x16xf32>
    %96 = arith.addf %93, %95 : vector<4x16xf32>
    %c8_60 = arith.constant 8 : index
    %c145_61 = arith.constant 145 : index
    %97 = vector.load %arg10[%c8_60, %c145_61] : memref<16x384xf32, #tpu.memory_space<vmem>>, vector<4x16xf32>
    tpu.vector_store %arg10[%c8_60, %c145_61], %96 {strides = array<i32>} : memref<16x384xf32, #tpu.memory_space<vmem>>, vector<4x16xf32>,
    %cst_62 = arith.constant 0.266666681 : f32
    %98 = vector.broadcast %cst_62 : f32 to vector<4x16xf32>
    %99 = arith.mulf %98, %46 : vector<4x16xf32>
    %cst_63 = arith.constant 0.733333349 : f32
    %100 = vector.broadcast %cst_63 : f32 to vector<4x16xf32>
    %101 = arith.mulf %100, %48 : vector<4x16xf32>
    %102 = arith.addf %99, %101 : vector<4x16xf32>
    %c8_64 = arith.constant 8 : index
    %c163_65 = arith.constant 163 : index
    %103 = vector.load %arg10[%c8_64, %c163_65] : memref<16x384xf32, #tpu.memory_space<vmem>>, vector<4x16xf32>
    tpu.vector_store %arg10[%c8_64, %c163_65], %102 {strides = array<i32>} : memref<16x384xf32, #tpu.memory_space<vmem>>, vector<4x16xf32>,
    %cst_66 = arith.constant 8.000000e-01 : f32
    %104 = vector.broadcast %cst_66 : f32 to vector<4x16xf32>
    %105 = arith.mulf %104, %48 : vector<4x16xf32>
    %cst_67 = arith.constant 2.000000e-01 : f32
    %106 = vector.broadcast %cst_67 : f32 to vector<4x16xf32>
    %107 = arith.mulf %106, %50 : vector<4x16xf32>
    %108 = arith.addf %105, %107 : vector<4x16xf32>
    %c8_68 = arith.constant 8 : index
    %c181_69 = arith.constant 181 : index
    %109 = vector.load %arg10[%c8_68, %c181_69] : memref<16x384xf32, #tpu.memory_space<vmem>>, vector<4x16xf32>
    tpu.vector_store %arg10[%c8_68, %c181_69], %108 {strides = array<i32>} : memref<16x384xf32, #tpu.memory_space<vmem>>, vector<4x16xf32>,
    %cst_70 = arith.constant 0.333333343 : f32
    %110 = vector.broadcast %cst_70 : f32 to vector<4x16xf32>
    %111 = arith.mulf %110, %48 : vector<4x16xf32>
    %cst_71 = arith.constant 0.666666686 : f32
    %112 = vector.broadcast %cst_71 : f32 to vector<4x16xf32>
    %113 = arith.mulf %112, %50 : vector<4x16xf32>
    %114 = arith.addf %111, %113 : vector<4x16xf32>
    %c8_72 = arith.constant 8 : index
    %c199_73 = arith.constant 199 : index
    %115 = vector.load %arg10[%c8_72, %c199_73] : memref<16x384xf32, #tpu.memory_space<vmem>>, vector<4x16xf32>
    tpu.vector_store %arg10[%c8_72, %c199_73], %114 {strides = array<i32>} : memref<16x384xf32, #tpu.memory_space<vmem>>, vector<4x16xf32>,
    %cst_74 = arith.constant 0.866666674 : f32
    %116 = vector.broadcast %cst_74 : f32 to vector<4x16xf32>
    %117 = arith.mulf %116, %50 : vector<4x16xf32>
    %cst_75 = arith.constant 0.13333334 : f32
    %118 = vector.broadcast %cst_75 : f32 to vector<4x16xf32>
    %119 = arith.mulf %118, %52 : vector<4x16xf32>
    %120 = arith.addf %117, %119 : vector<4x16xf32>
    %c8_76 = arith.constant 8 : index
    %c217_77 = arith.constant 217 : index
    %121 = vector.load %arg10[%c8_76, %c217_77] : memref<16x384xf32, #tpu.memory_space<vmem>>, vector<4x16xf32>
    tpu.vector_store %arg10[%c8_76, %c217_77], %120 {strides = array<i32>} : memref<16x384xf32, #tpu.memory_space<vmem>>, vector<4x16xf32>,
    %cst_78 = arith.constant 4.000000e-01 : f32
    %122 = vector.broadcast %cst_78 : f32 to vector<4x16xf32>
    %123 = arith.mulf %122, %50 : vector<4x16xf32>
    %cst_79 = arith.constant 6.000000e-01 : f32
    %124 = vector.broadcast %cst_79 : f32 to vector<4x16xf32>
    %125 = arith.mulf %124, %52 : vector<4x16xf32>
    %126 = arith.addf %123, %125 : vector<4x16xf32>
    %c8_80 = arith.constant 8 : index
    %c235_81 = arith.constant 235 : index
    %127 = vector.load %arg10[%c8_80, %c235_81] : memref<16x384xf32, #tpu.memory_space<vmem>>, vector<4x16xf32>
    tpu.vector_store %arg10[%c8_80, %c235_81], %126 {strides = array<i32>} : memref<16x384xf32, #tpu.memory_space<vmem>>, vector<4x16xf32>,
    %cst_82 = arith.constant 0.933333337 : f32
    %128 = vector.broadcast %cst_82 : f32 to vector<4x16xf32>
    %129 = arith.mulf %128, %52 : vector<4x16xf32>
    %cst_83 = arith.constant 0.0666666701 : f32
    %130 = vector.broadcast %cst_83 : f32 to vector<4x16xf32>
    %131 = arith.mulf %130, %54 : vector<4x16xf32>
    %132 = arith.addf %129, %131 : vector<4x16xf32>
    %c8_84 = arith.constant 8 : index
    %c253_85 = arith.constant 253 : index
    %133 = vector.load %arg10[%c8_84, %c253_85] : memref<16x384xf32, #tpu.memory_space<vmem>>, vector<4x16xf32>
    tpu.vector_store %arg10[%c8_84, %c253_85], %132 {strides = array<i32>} : memref<16x384xf32, #tpu.memory_space<vmem>>, vector<4x16xf32>,
    %cst_86 = arith.constant 0.466666669 : f32
    %134 = vector.broadcast %cst_86 : f32 to vector<4x16xf32>
    %135 = arith.mulf %134, %52 : vector<4x16xf32>
    %cst_87 = arith.constant 0.533333361 : f32
    %136 = vector.broadcast %cst_87 : f32 to vector<4x16xf32>
    %137 = arith.mulf %136, %54 : vector<4x16xf32>
    %138 = arith.addf %135, %137 : vector<4x16xf32>
    %c8_88 = arith.constant 8 : index
    %c271_89 = arith.constant 271 : index
    %139 = vector.load %arg10[%c8_88, %c271_89] : memref<16x384xf32, #tpu.memory_space<vmem>>, vector<4x16xf32>
    tpu.vector_store %arg10[%c8_88, %c271_89], %138 {strides = array<i32>} : memref<16x384xf32, #tpu.memory_space<vmem>>, vector<4x16xf32>,
    %c8_90 = arith.constant 8 : index
    %c289_91 = arith.constant 289 : index
    %140 = vector.load %arg10[%c8_90, %c289_91] : memref<16x384xf32, #tpu.memory_space<vmem>>, vector<4x16xf32>
    tpu.vector_store %arg10[%c8_90, %c289_91], %54 {strides = array<i32>} : memref<16x384xf32, #tpu.memory_space<vmem>>, vector<4x16xf32>,
    %c0_92 = arith.constant 0 : index
    %c0_93 = arith.constant 0 : index
    %141 = vector.load %arg4[%c0_92, %c0_93] : memref<1x384xf32, #tpu.memory_space<vmem>>, vector<1x384xf32>
    %c0_94 = arith.constant 0 : index
    %c0_95 = arith.constant 0 : index
    %142 = vector.load %arg10[%c0_94, %c0_95] : memref<16x384xf32, #tpu.memory_space<vmem>>, vector<16x384xf32>
    %c0_96 = arith.constant 0 : index
    %c0_97 = arith.constant 0 : index
    %143 = vector.load %arg6[%c0_96, %c0_97] : memref<8x1xf32, #tpu.memory_space<vmem>>, vector<8x1xf32>
    %c19_i32 = arith.constant 19 : i32
    %144 = tpu.dynamic_rotate %142 by %c19_i32 dim 1 : vector<16x384xf32>, i32 -> vector<16x384xf32>
    %c0_98 = arith.constant 0 : index
    %c0_99 = arith.constant 0 : index
    %c0_100 = arith.constant 0 : index
    %145 = vector.load %arg5[%c0_98, %c0_99, %c0_100] : memref<9x8x16xbf16, #tpu.memory_space<vmem>>, vector<1x8x16xbf16>
    %146 = vector.shape_cast %145 : vector<1x8x16xbf16> to vector<8x16xbf16>
    %147 = arith.truncf %144 : vector<16x384xf32> to vector<16x384xbf16>
    %cst_101 = arith.constant dense<0.000000e+00> : vector<8x384xf32>
    %148 = tpu.matmul %146, %147, %cst_101 {dimension_numbers = #tpu.dot_dimension_numbers<[1], [0], [0], [1], [0, 0, 1, 1], [], []>} : vector<8x16xbf16>, vector<16x384xbf16>, vector<8x384xf32> -> vector<8x384xf32>
    %c18_i32 = arith.constant 18 : i32
    %149 = tpu.dynamic_rotate %142 by %c18_i32 dim 1 : vector<16x384xf32>, i32 -> vector<16x384xf32>
    %c1 = arith.constant 1 : index
    %c0_102 = arith.constant 0 : index
    %c0_103 = arith.constant 0 : index
    %150 = vector.load %arg5[%c1, %c0_102, %c0_103] : memref<9x8x16xbf16, #tpu.memory_space<vmem>>, vector<1x8x16xbf16>
    %151 = vector.shape_cast %150 : vector<1x8x16xbf16> to vector<8x16xbf16>
    %152 = arith.truncf %149 : vector<16x384xf32> to vector<16x384xbf16>
    %cst_104 = arith.constant dense<0.000000e+00> : vector<8x384xf32>
    %153 = tpu.matmul %151, %152, %cst_104 {dimension_numbers = #tpu.dot_dimension_numbers<[1], [0], [0], [1], [0, 0, 1, 1], [], []>} : vector<8x16xbf16>, vector<16x384xbf16>, vector<8x384xf32> -> vector<8x384xf32>
    %154 = arith.addf %148, %153 : vector<8x384xf32>
    %c17_i32 = arith.constant 17 : i32
    %155 = tpu.dynamic_rotate %142 by %c17_i32 dim 1 : vector<16x384xf32>, i32 -> vector<16x384xf32>
    %c2 = arith.constant 2 : index
    %c0_105 = arith.constant 0 : index
    %c0_106 = arith.constant 0 : index
    %156 = vector.load %arg5[%c2, %c0_105, %c0_106] : memref<9x8x16xbf16, #tpu.memory_space<vmem>>, vector<1x8x16xbf16>
    %157 = vector.shape_cast %156 : vector<1x8x16xbf16> to vector<8x16xbf16>
    %158 = arith.truncf %155 : vector<16x384xf32> to vector<16x384xbf16>
    %cst_107 = arith.constant dense<0.000000e+00> : vector<8x384xf32>
    %159 = tpu.matmul %157, %158, %cst_107 {dimension_numbers = #tpu.dot_dimension_numbers<[1], [0], [0], [1], [0, 0, 1, 1], [], []>} : vector<8x16xbf16>, vector<16x384xbf16>, vector<8x384xf32> -> vector<8x384xf32>
    %160 = arith.addf %154, %159 : vector<8x384xf32>
    %c1_i32 = arith.constant 1 : i32
    %161 = tpu.dynamic_rotate %142 by %c1_i32 dim 1 : vector<16x384xf32>, i32 -> vector<16x384xf32>
    %c3 = arith.constant 3 : index
    %c0_108 = arith.constant 0 : index
    %c0_109 = arith.constant 0 : index
    %162 = vector.load %arg5[%c3, %c0_108, %c0_109] : memref<9x8x16xbf16, #tpu.memory_space<vmem>>, vector<1x8x16xbf16>
    %163 = vector.shape_cast %162 : vector<1x8x16xbf16> to vector<8x16xbf16>
    %164 = arith.truncf %161 : vector<16x384xf32> to vector<16x384xbf16>
    %cst_110 = arith.constant dense<0.000000e+00> : vector<8x384xf32>
    %165 = tpu.matmul %163, %164, %cst_110 {dimension_numbers = #tpu.dot_dimension_numbers<[1], [0], [0], [1], [0, 0, 1, 1], [], []>} : vector<8x16xbf16>, vector<16x384xbf16>, vector<8x384xf32> -> vector<8x384xf32>
    %166 = arith.addf %160, %165 : vector<8x384xf32>
    %c4 = arith.constant 4 : index
    %c0_111 = arith.constant 0 : index
    %c0_112 = arith.constant 0 : index
    %167 = vector.load %arg5[%c4, %c0_111, %c0_112] : memref<9x8x16xbf16, #tpu.memory_space<vmem>>, vector<1x8x16xbf16>
    %168 = vector.shape_cast %167 : vector<1x8x16xbf16> to vector<8x16xbf16>
    %169 = arith.truncf %142 : vector<16x384xf32> to vector<16x384xbf16>
    %cst_113 = arith.constant dense<0.000000e+00> : vector<8x384xf32>
    %170 = tpu.matmul %168, %169, %cst_113 {dimension_numbers = #tpu.dot_dimension_numbers<[1], [0], [0], [1], [0, 0, 1, 1], [], []>} : vector<8x16xbf16>, vector<16x384xbf16>, vector<8x384xf32> -> vector<8x384xf32>
    %171 = arith.addf %166, %170 : vector<8x384xf32>
    %c383_i32 = arith.constant 383 : i32
    %172 = tpu.dynamic_rotate %142 by %c383_i32 dim 1 : vector<16x384xf32>, i32 -> vector<16x384xf32>
    %c5 = arith.constant 5 : index
    %c0_114 = arith.constant 0 : index
    %c0_115 = arith.constant 0 : index
    %173 = vector.load %arg5[%c5, %c0_114, %c0_115] : memref<9x8x16xbf16, #tpu.memory_space<vmem>>, vector<1x8x16xbf16>
    %174 = vector.shape_cast %173 : vector<1x8x16xbf16> to vector<8x16xbf16>
    %175 = arith.truncf %172 : vector<16x384xf32> to vector<16x384xbf16>
    %cst_116 = arith.constant dense<0.000000e+00> : vector<8x384xf32>
    %176 = tpu.matmul %174, %175, %cst_116 {dimension_numbers = #tpu.dot_dimension_numbers<[1], [0], [0], [1], [0, 0, 1, 1], [], []>} : vector<8x16xbf16>, vector<16x384xbf16>, vector<8x384xf32> -> vector<8x384xf32>
    %177 = arith.addf %171, %176 : vector<8x384xf32>
    %c367_i32 = arith.constant 367 : i32
    %178 = tpu.dynamic_rotate %142 by %c367_i32 dim 1 : vector<16x384xf32>, i32 -> vector<16x384xf32>
    %c6 = arith.constant 6 : index
    %c0_117 = arith.constant 0 : index
    %c0_118 = arith.constant 0 : index
    %179 = vector.load %arg5[%c6, %c0_117, %c0_118] : memref<9x8x16xbf16, #tpu.memory_space<vmem>>, vector<1x8x16xbf16>
    %180 = vector.shape_cast %179 : vector<1x8x16xbf16> to vector<8x16xbf16>
    %181 = arith.truncf %178 : vector<16x384xf32> to vector<16x384xbf16>
    %cst_119 = arith.constant dense<0.000000e+00> : vector<8x384xf32>
    %182 = tpu.matmul %180, %181, %cst_119 {dimension_numbers = #tpu.dot_dimension_numbers<[1], [0], [0], [1], [0, 0, 1, 1], [], []>} : vector<8x16xbf16>, vector<16x384xbf16>, vector<8x384xf32> -> vector<8x384xf32>
    %183 = arith.addf %177, %182 : vector<8x384xf32>
    %c366_i32 = arith.constant 366 : i32
    %184 = tpu.dynamic_rotate %142 by %c366_i32 dim 1 : vector<16x384xf32>, i32 -> vector<16x384xf32>
    %c7 = arith.constant 7 : index
    %c0_120 = arith.constant 0 : index
    %c0_121 = arith.constant 0 : index
    %185 = vector.load %arg5[%c7, %c0_120, %c0_121] : memref<9x8x16xbf16, #tpu.memory_space<vmem>>, vector<1x8x16xbf16>
    %186 = vector.shape_cast %185 : vector<1x8x16xbf16> to vector<8x16xbf16>
    %187 = arith.truncf %184 : vector<16x384xf32> to vector<16x384xbf16>
    %cst_122 = arith.constant dense<0.000000e+00> : vector<8x384xf32>
    %188 = tpu.matmul %186, %187, %cst_122 {dimension_numbers = #tpu.dot_dimension_numbers<[1], [0], [0], [1], [0, 0, 1, 1], [], []>} : vector<8x16xbf16>, vector<16x384xbf16>, vector<8x384xf32> -> vector<8x384xf32>
    %189 = arith.addf %183, %188 : vector<8x384xf32>
    %c365_i32 = arith.constant 365 : i32
    %190 = tpu.dynamic_rotate %142 by %c365_i32 dim 1 : vector<16x384xf32>, i32 -> vector<16x384xf32>
    %c8_123 = arith.constant 8 : index
    %c0_124 = arith.constant 0 : index
    %c0_125 = arith.constant 0 : index
    %191 = vector.load %arg5[%c8_123, %c0_124, %c0_125] : memref<9x8x16xbf16, #tpu.memory_space<vmem>>, vector<1x8x16xbf16>
    %192 = vector.shape_cast %191 : vector<1x8x16xbf16> to vector<8x16xbf16>
    %193 = arith.truncf %190 : vector<16x384xf32> to vector<16x384xbf16>
    %cst_126 = arith.constant dense<0.000000e+00> : vector<8x384xf32>
    %194 = tpu.matmul %192, %193, %cst_126 {dimension_numbers = #tpu.dot_dimension_numbers<[1], [0], [0], [1], [0, 0, 1, 1], [], []>} : vector<8x16xbf16>, vector<16x384xbf16>, vector<8x384xf32> -> vector<8x384xf32>
    %195 = arith.addf %189, %194 : vector<8x384xf32>
    %196 = vector.broadcast %143 : vector<8x1xf32> to vector<8x384xf32>
    %197 = arith.addf %195, %196 : vector<8x384xf32>
    %cst_127 = arith.constant 0.000000e+00 : f32
    %198 = vector.broadcast %cst_127 : f32 to vector<8x384xf32>
    %199 = arith.maximumf %197, %198 : vector<8x384xf32>
    %200 = vector.broadcast %141 : vector<1x384xf32> to vector<8x384xf32>
    %201 = arith.mulf %199, %200 : vector<8x384xf32>
    %c0_128 = arith.constant 0 : index
    %c0_129 = arith.constant 0 : index
    %202 = vector.load %arg8[%c0_128, %c0_129] : memref<8x1xf32, #tpu.memory_space<vmem>>, vector<8x1xf32>
    %c19_i32_130 = arith.constant 19 : i32
    %203 = tpu.dynamic_rotate %201 by %c19_i32_130 dim 1 : vector<8x384xf32>, i32 -> vector<8x384xf32>
    %c0_131 = arith.constant 0 : index
    %c0_132 = arith.constant 0 : index
    %c0_133 = arith.constant 0 : index
    %204 = vector.load %arg7[%c0_131, %c0_132, %c0_133] : memref<9x8x8xbf16, #tpu.memory_space<vmem>>, vector<1x8x8xbf16>
    %205 = vector.shape_cast %204 : vector<1x8x8xbf16> to vector<8x8xbf16>
    %206 = arith.truncf %203 : vector<8x384xf32> to vector<8x384xbf16>
    %cst_134 = arith.constant dense<0.000000e+00> : vector<8x384xf32>
    %207 = tpu.matmul %205, %206, %cst_134 {dimension_numbers = #tpu.dot_dimension_numbers<[1], [0], [0], [1], [0, 0, 1, 1], [], []>} : vector<8x8xbf16>, vector<8x384xbf16>, vector<8x384xf32> -> vector<8x384xf32>
    %c18_i32_135 = arith.constant 18 : i32
    %208 = tpu.dynamic_rotate %201 by %c18_i32_135 dim 1 : vector<8x384xf32>, i32 -> vector<8x384xf32>
    %c1_136 = arith.constant 1 : index
    %c0_137 = arith.constant 0 : index
    %c0_138 = arith.constant 0 : index
    %209 = vector.load %arg7[%c1_136, %c0_137, %c0_138] : memref<9x8x8xbf16, #tpu.memory_space<vmem>>, vector<1x8x8xbf16>
    %210 = vector.shape_cast %209 : vector<1x8x8xbf16> to vector<8x8xbf16>
    %211 = arith.truncf %208 : vector<8x384xf32> to vector<8x384xbf16>
    %cst_139 = arith.constant dense<0.000000e+00> : vector<8x384xf32>
    %212 = tpu.matmul %210, %211, %cst_139 {dimension_numbers = #tpu.dot_dimension_numbers<[1], [0], [0], [1], [0, 0, 1, 1], [], []>} : vector<8x8xbf16>, vector<8x384xbf16>, vector<8x384xf32> -> vector<8x384xf32>
    %213 = arith.addf %207, %212 : vector<8x384xf32>
    %c17_i32_140 = arith.constant 17 : i32
    %214 = tpu.dynamic_rotate %201 by %c17_i32_140 dim 1 : vector<8x384xf32>, i32 -> vector<8x384xf32>
    %c2_141 = arith.constant 2 : index
    %c0_142 = arith.constant 0 : index
    %c0_143 = arith.constant 0 : index
    %215 = vector.load %arg7[%c2_141, %c0_142, %c0_143] : memref<9x8x8xbf16, #tpu.memory_space<vmem>>, vector<1x8x8xbf16>
    %216 = vector.shape_cast %215 : vector<1x8x8xbf16> to vector<8x8xbf16>
    %217 = arith.truncf %214 : vector<8x384xf32> to vector<8x384xbf16>
    %cst_144 = arith.constant dense<0.000000e+00> : vector<8x384xf32>
    %218 = tpu.matmul %216, %217, %cst_144 {dimension_numbers = #tpu.dot_dimension_numbers<[1], [0], [0], [1], [0, 0, 1, 1], [], []>} : vector<8x8xbf16>, vector<8x384xbf16>, vector<8x384xf32> -> vector<8x384xf32>
    %219 = arith.addf %213, %218 : vector<8x384xf32>
    %c1_i32_145 = arith.constant 1 : i32
    %220 = tpu.dynamic_rotate %201 by %c1_i32_145 dim 1 : vector<8x384xf32>, i32 -> vector<8x384xf32>
    %c3_146 = arith.constant 3 : index
    %c0_147 = arith.constant 0 : index
    %c0_148 = arith.constant 0 : index
    %221 = vector.load %arg7[%c3_146, %c0_147, %c0_148] : memref<9x8x8xbf16, #tpu.memory_space<vmem>>, vector<1x8x8xbf16>
    %222 = vector.shape_cast %221 : vector<1x8x8xbf16> to vector<8x8xbf16>
    %223 = arith.truncf %220 : vector<8x384xf32> to vector<8x384xbf16>
    %cst_149 = arith.constant dense<0.000000e+00> : vector<8x384xf32>
    %224 = tpu.matmul %222, %223, %cst_149 {dimension_numbers = #tpu.dot_dimension_numbers<[1], [0], [0], [1], [0, 0, 1, 1], [], []>} : vector<8x8xbf16>, vector<8x384xbf16>, vector<8x384xf32> -> vector<8x384xf32>
    %225 = arith.addf %219, %224 : vector<8x384xf32>
    %c4_150 = arith.constant 4 : index
    %c0_151 = arith.constant 0 : index
    %c0_152 = arith.constant 0 : index
    %226 = vector.load %arg7[%c4_150, %c0_151, %c0_152] : memref<9x8x8xbf16, #tpu.memory_space<vmem>>, vector<1x8x8xbf16>
    %227 = vector.shape_cast %226 : vector<1x8x8xbf16> to vector<8x8xbf16>
    %228 = arith.truncf %201 : vector<8x384xf32> to vector<8x384xbf16>
    %cst_153 = arith.constant dense<0.000000e+00> : vector<8x384xf32>
    %229 = tpu.matmul %227, %228, %cst_153 {dimension_numbers = #tpu.dot_dimension_numbers<[1], [0], [0], [1], [0, 0, 1, 1], [], []>} : vector<8x8xbf16>, vector<8x384xbf16>, vector<8x384xf32> -> vector<8x384xf32>
    %230 = arith.addf %225, %229 : vector<8x384xf32>
    %c383_i32_154 = arith.constant 383 : i32
    %231 = tpu.dynamic_rotate %201 by %c383_i32_154 dim 1 : vector<8x384xf32>, i32 -> vector<8x384xf32>
    %c5_155 = arith.constant 5 : index
    %c0_156 = arith.constant 0 : index
    %c0_157 = arith.constant 0 : index
    %232 = vector.load %arg7[%c5_155, %c0_156, %c0_157] : memref<9x8x8xbf16, #tpu.memory_space<vmem>>, vector<1x8x8xbf16>
    %233 = vector.shape_cast %232 : vector<1x8x8xbf16> to vector<8x8xbf16>
    %234 = arith.truncf %231 : vector<8x384xf32> to vector<8x384xbf16>
    %cst_158 = arith.constant dense<0.000000e+00> : vector<8x384xf32>
    %235 = tpu.matmul %233, %234, %cst_158 {dimension_numbers = #tpu.dot_dimension_numbers<[1], [0], [0], [1], [0, 0, 1, 1], [], []>} : vector<8x8xbf16>, vector<8x384xbf16>, vector<8x384xf32> -> vector<8x384xf32>
    %236 = arith.addf %230, %235 : vector<8x384xf32>
    %c367_i32_159 = arith.constant 367 : i32
    %237 = tpu.dynamic_rotate %201 by %c367_i32_159 dim 1 : vector<8x384xf32>, i32 -> vector<8x384xf32>
    %c6_160 = arith.constant 6 : index
    %c0_161 = arith.constant 0 : index
    %c0_162 = arith.constant 0 : index
    %238 = vector.load %arg7[%c6_160, %c0_161, %c0_162] : memref<9x8x8xbf16, #tpu.memory_space<vmem>>, vector<1x8x8xbf16>
    %239 = vector.shape_cast %238 : vector<1x8x8xbf16> to vector<8x8xbf16>
    %240 = arith.truncf %237 : vector<8x384xf32> to vector<8x384xbf16>
    %cst_163 = arith.constant dense<0.000000e+00> : vector<8x384xf32>
    %241 = tpu.matmul %239, %240, %cst_163 {dimension_numbers = #tpu.dot_dimension_numbers<[1], [0], [0], [1], [0, 0, 1, 1], [], []>} : vector<8x8xbf16>, vector<8x384xbf16>, vector<8x384xf32> -> vector<8x384xf32>
    %242 = arith.addf %236, %241 : vector<8x384xf32>
    %c366_i32_164 = arith.constant 366 : i32
    %243 = tpu.dynamic_rotate %201 by %c366_i32_164 dim 1 : vector<8x384xf32>, i32 -> vector<8x384xf32>
    %c7_165 = arith.constant 7 : index
    %c0_166 = arith.constant 0 : index
    %c0_167 = arith.constant 0 : index
    %244 = vector.load %arg7[%c7_165, %c0_166, %c0_167] : memref<9x8x8xbf16, #tpu.memory_space<vmem>>, vector<1x8x8xbf16>
    %245 = vector.shape_cast %244 : vector<1x8x8xbf16> to vector<8x8xbf16>
    %246 = arith.truncf %243 : vector<8x384xf32> to vector<8x384xbf16>
    %cst_168 = arith.constant dense<0.000000e+00> : vector<8x384xf32>
    %247 = tpu.matmul %245, %246, %cst_168 {dimension_numbers = #tpu.dot_dimension_numbers<[1], [0], [0], [1], [0, 0, 1, 1], [], []>} : vector<8x8xbf16>, vector<8x384xbf16>, vector<8x384xf32> -> vector<8x384xf32>
    %248 = arith.addf %242, %247 : vector<8x384xf32>
    %c365_i32_169 = arith.constant 365 : i32
    %249 = tpu.dynamic_rotate %201 by %c365_i32_169 dim 1 : vector<8x384xf32>, i32 -> vector<8x384xf32>
    %c8_170 = arith.constant 8 : index
    %c0_171 = arith.constant 0 : index
    %c0_172 = arith.constant 0 : index
    %250 = vector.load %arg7[%c8_170, %c0_171, %c0_172] : memref<9x8x8xbf16, #tpu.memory_space<vmem>>, vector<1x8x8xbf16>
    %251 = vector.shape_cast %250 : vector<1x8x8xbf16> to vector<8x8xbf16>
    %252 = arith.truncf %249 : vector<8x384xf32> to vector<8x384xbf16>
    %cst_173 = arith.constant dense<0.000000e+00> : vector<8x384xf32>
    %253 = tpu.matmul %251, %252, %cst_173 {dimension_numbers = #tpu.dot_dimension_numbers<[1], [0], [0], [1], [0, 0, 1, 1], [], []>} : vector<8x8xbf16>, vector<8x384xbf16>, vector<8x384xf32> -> vector<8x384xf32>
    %254 = arith.addf %248, %253 : vector<8x384xf32>
    %255 = vector.broadcast %202 : vector<8x1xf32> to vector<8x384xf32>
    %256 = arith.addf %254, %255 : vector<8x384xf32>
    %cst_174 = arith.constant 0.000000e+00 : f32
    %257 = vector.broadcast %cst_174 : f32 to vector<8x384xf32>
    %258 = arith.maximumf %256, %257 : vector<8x384xf32>
    %259 = vector.extract_strided_slice %258 {offsets = [0, 19], sizes = [4, 16], strides = [1, 1]} : vector<8x384xf32> to vector<4x16xf32>
    %c0_175 = arith.constant 0 : index
    %c0_176 = arith.constant 0 : index
    %c0_177 = arith.constant 0 : index
    %260 = vector.load %arg9[%c0_175, %c0_176, %c0_177] : memref<1x4x256xf32, #tpu.memory_space<vmem>>, vector<1x4x16xf32>
    %261 = vector.shape_cast %260 : vector<1x4x16xf32> to vector<4x16xf32>
    %262 = vector.shape_cast %259 : vector<4x16xf32> to vector<1x4x16xf32>
    tpu.vector_store %arg9[%c0_175, %c0_176, %c0_177], %262 {strides = array<i32>} : memref<1x4x256xf32, #tpu.memory_space<vmem>>, vector<1x4x16xf32>,
    %263 = vector.extract_strided_slice %258 {offsets = [0, 37], sizes = [4, 16], strides = [1, 1]} : vector<8x384xf32> to vector<4x16xf32>
    %c0_178 = arith.constant 0 : index
    %c0_179 = arith.constant 0 : index
    %c16 = arith.constant 16 : index
    %264 = vector.load %arg9[%c0_178, %c0_179, %c16] : memref<1x4x256xf32, #tpu.memory_space<vmem>>, vector<1x4x16xf32>
    %265 = vector.shape_cast %264 : vector<1x4x16xf32> to vector<4x16xf32>
    %266 = vector.shape_cast %263 : vector<4x16xf32> to vector<1x4x16xf32>
    tpu.vector_store %arg9[%c0_178, %c0_179, %c16], %266 {strides = array<i32>} : memref<1x4x256xf32, #tpu.memory_space<vmem>>, vector<1x4x16xf32>,
    %267 = vector.extract_strided_slice %258 {offsets = [0, 55], sizes = [4, 16], strides = [1, 1]} : vector<8x384xf32> to vector<4x16xf32>
    %c0_180 = arith.constant 0 : index
    %c0_181 = arith.constant 0 : index
    %c32 = arith.constant 32 : index
    %268 = vector.load %arg9[%c0_180, %c0_181, %c32] : memref<1x4x256xf32, #tpu.memory_space<vmem>>, vector<1x4x16xf32>
    %269 = vector.shape_cast %268 : vector<1x4x16xf32> to vector<4x16xf32>
    %270 = vector.shape_cast %267 : vector<4x16xf32> to vector<1x4x16xf32>
    tpu.vector_store %arg9[%c0_180, %c0_181, %c32], %270 {strides = array<i32>} : memref<1x4x256xf32, #tpu.memory_space<vmem>>, vector<1x4x16xf32>,
    %271 = vector.extract_strided_slice %258 {offsets = [0, 73], sizes = [4, 16], strides = [1, 1]} : vector<8x384xf32> to vector<4x16xf32>
    %c0_182 = arith.constant 0 : index
    %c0_183 = arith.constant 0 : index
    %c48 = arith.constant 48 : index
    %272 = vector.load %arg9[%c0_182, %c0_183, %c48] : memref<1x4x256xf32, #tpu.memory_space<vmem>>, vector<1x4x16xf32>
    %273 = vector.shape_cast %272 : vector<1x4x16xf32> to vector<4x16xf32>
    %274 = vector.shape_cast %271 : vector<4x16xf32> to vector<1x4x16xf32>
    tpu.vector_store %arg9[%c0_182, %c0_183, %c48], %274 {strides = array<i32>} : memref<1x4x256xf32, #tpu.memory_space<vmem>>, vector<1x4x16xf32>,
    %275 = vector.extract_strided_slice %258 {offsets = [0, 91], sizes = [4, 16], strides = [1, 1]} : vector<8x384xf32> to vector<4x16xf32>
    %c0_184 = arith.constant 0 : index
    %c0_185 = arith.constant 0 : index
    %c64 = arith.constant 64 : index
    %276 = vector.load %arg9[%c0_184, %c0_185, %c64] : memref<1x4x256xf32, #tpu.memory_space<vmem>>, vector<1x4x16xf32>
    %277 = vector.shape_cast %276 : vector<1x4x16xf32> to vector<4x16xf32>
    %278 = vector.shape_cast %275 : vector<4x16xf32> to vector<1x4x16xf32>
    tpu.vector_store %arg9[%c0_184, %c0_185, %c64], %278 {strides = array<i32>} : memref<1x4x256xf32, #tpu.memory_space<vmem>>, vector<1x4x16xf32>,
    %279 = vector.extract_strided_slice %258 {offsets = [0, 109], sizes = [4, 16], strides = [1, 1]} : vector<8x384xf32> to vector<4x16xf32>
    %c0_186 = arith.constant 0 : index
    %c0_187 = arith.constant 0 : index
    %c80 = arith.constant 80 : index
    %280 = vector.load %arg9[%c0_186, %c0_187, %c80] : memref<1x4x256xf32, #tpu.memory_space<vmem>>, vector<1x4x16xf32>
    %281 = vector.shape_cast %280 : vector<1x4x16xf32> to vector<4x16xf32>
    %282 = vector.shape_cast %279 : vector<4x16xf32> to vector<1x4x16xf32>
    tpu.vector_store %arg9[%c0_186, %c0_187, %c80], %282 {strides = array<i32>} : memref<1x4x256xf32, #tpu.memory_space<vmem>>, vector<1x4x16xf32>,
    %283 = vector.extract_strided_slice %258 {offsets = [0, 127], sizes = [4, 16], strides = [1, 1]} : vector<8x384xf32> to vector<4x16xf32>
    %c0_188 = arith.constant 0 : index
    %c0_189 = arith.constant 0 : index
    %c96 = arith.constant 96 : index
    %284 = vector.load %arg9[%c0_188, %c0_189, %c96] : memref<1x4x256xf32, #tpu.memory_space<vmem>>, vector<1x4x16xf32>
    %285 = vector.shape_cast %284 : vector<1x4x16xf32> to vector<4x16xf32>
    %286 = vector.shape_cast %283 : vector<4x16xf32> to vector<1x4x16xf32>
    tpu.vector_store %arg9[%c0_188, %c0_189, %c96], %286 {strides = array<i32>} : memref<1x4x256xf32, #tpu.memory_space<vmem>>, vector<1x4x16xf32>,
    %287 = vector.extract_strided_slice %258 {offsets = [0, 145], sizes = [4, 16], strides = [1, 1]} : vector<8x384xf32> to vector<4x16xf32>
    %c0_190 = arith.constant 0 : index
    %c0_191 = arith.constant 0 : index
    %c112 = arith.constant 112 : index
    %288 = vector.load %arg9[%c0_190, %c0_191, %c112] : memref<1x4x256xf32, #tpu.memory_space<vmem>>, vector<1x4x16xf32>
    %289 = vector.shape_cast %288 : vector<1x4x16xf32> to vector<4x16xf32>
    %290 = vector.shape_cast %287 : vector<4x16xf32> to vector<1x4x16xf32>
    tpu.vector_store %arg9[%c0_190, %c0_191, %c112], %290 {strides = array<i32>} : memref<1x4x256xf32, #tpu.memory_space<vmem>>, vector<1x4x16xf32>,
    %291 = vector.extract_strided_slice %258 {offsets = [0, 163], sizes = [4, 16], strides = [1, 1]} : vector<8x384xf32> to vector<4x16xf32>
    %c0_192 = arith.constant 0 : index
    %c0_193 = arith.constant 0 : index
    %c128 = arith.constant 128 : index
    %292 = vector.load %arg9[%c0_192, %c0_193, %c128] : memref<1x4x256xf32, #tpu.memory_space<vmem>>, vector<1x4x16xf32>
    %293 = vector.shape_cast %292 : vector<1x4x16xf32> to vector<4x16xf32>
    %294 = vector.shape_cast %291 : vector<4x16xf32> to vector<1x4x16xf32>
    tpu.vector_store %arg9[%c0_192, %c0_193, %c128], %294 {strides = array<i32>} : memref<1x4x256xf32, #tpu.memory_space<vmem>>, vector<1x4x16xf32>,
    %295 = vector.extract_strided_slice %258 {offsets = [0, 181], sizes = [4, 16], strides = [1, 1]} : vector<8x384xf32> to vector<4x16xf32>
    %c0_194 = arith.constant 0 : index
    %c0_195 = arith.constant 0 : index
    %c144 = arith.constant 144 : index
    %296 = vector.load %arg9[%c0_194, %c0_195, %c144] : memref<1x4x256xf32, #tpu.memory_space<vmem>>, vector<1x4x16xf32>
    %297 = vector.shape_cast %296 : vector<1x4x16xf32> to vector<4x16xf32>
    %298 = vector.shape_cast %295 : vector<4x16xf32> to vector<1x4x16xf32>
    tpu.vector_store %arg9[%c0_194, %c0_195, %c144], %298 {strides = array<i32>} : memref<1x4x256xf32, #tpu.memory_space<vmem>>, vector<1x4x16xf32>,
    %299 = vector.extract_strided_slice %258 {offsets = [0, 199], sizes = [4, 16], strides = [1, 1]} : vector<8x384xf32> to vector<4x16xf32>
    %c0_196 = arith.constant 0 : index
    %c0_197 = arith.constant 0 : index
    %c160 = arith.constant 160 : index
    %300 = vector.load %arg9[%c0_196, %c0_197, %c160] : memref<1x4x256xf32, #tpu.memory_space<vmem>>, vector<1x4x16xf32>
    %301 = vector.shape_cast %300 : vector<1x4x16xf32> to vector<4x16xf32>
    %302 = vector.shape_cast %299 : vector<4x16xf32> to vector<1x4x16xf32>
    tpu.vector_store %arg9[%c0_196, %c0_197, %c160], %302 {strides = array<i32>} : memref<1x4x256xf32, #tpu.memory_space<vmem>>, vector<1x4x16xf32>,
    %303 = vector.extract_strided_slice %258 {offsets = [0, 217], sizes = [4, 16], strides = [1, 1]} : vector<8x384xf32> to vector<4x16xf32>
    %c0_198 = arith.constant 0 : index
    %c0_199 = arith.constant 0 : index
    %c176 = arith.constant 176 : index
    %304 = vector.load %arg9[%c0_198, %c0_199, %c176] : memref<1x4x256xf32, #tpu.memory_space<vmem>>, vector<1x4x16xf32>
    %305 = vector.shape_cast %304 : vector<1x4x16xf32> to vector<4x16xf32>
    %306 = vector.shape_cast %303 : vector<4x16xf32> to vector<1x4x16xf32>
    tpu.vector_store %arg9[%c0_198, %c0_199, %c176], %306 {strides = array<i32>} : memref<1x4x256xf32, #tpu.memory_space<vmem>>, vector<1x4x16xf32>,
    %307 = vector.extract_strided_slice %258 {offsets = [0, 235], sizes = [4, 16], strides = [1, 1]} : vector<8x384xf32> to vector<4x16xf32>
    %c0_200 = arith.constant 0 : index
    %c0_201 = arith.constant 0 : index
    %c192 = arith.constant 192 : index
    %308 = vector.load %arg9[%c0_200, %c0_201, %c192] : memref<1x4x256xf32, #tpu.memory_space<vmem>>, vector<1x4x16xf32>
    %309 = vector.shape_cast %308 : vector<1x4x16xf32> to vector<4x16xf32>
    %310 = vector.shape_cast %307 : vector<4x16xf32> to vector<1x4x16xf32>
    tpu.vector_store %arg9[%c0_200, %c0_201, %c192], %310 {strides = array<i32>} : memref<1x4x256xf32, #tpu.memory_space<vmem>>, vector<1x4x16xf32>,
    %311 = vector.extract_strided_slice %258 {offsets = [0, 253], sizes = [4, 16], strides = [1, 1]} : vector<8x384xf32> to vector<4x16xf32>
    %c0_202 = arith.constant 0 : index
    %c0_203 = arith.constant 0 : index
    %c208 = arith.constant 208 : index
    %312 = vector.load %arg9[%c0_202, %c0_203, %c208] : memref<1x4x256xf32, #tpu.memory_space<vmem>>, vector<1x4x16xf32>
    %313 = vector.shape_cast %312 : vector<1x4x16xf32> to vector<4x16xf32>
    %314 = vector.shape_cast %311 : vector<4x16xf32> to vector<1x4x16xf32>
    tpu.vector_store %arg9[%c0_202, %c0_203, %c208], %314 {strides = array<i32>} : memref<1x4x256xf32, #tpu.memory_space<vmem>>, vector<1x4x16xf32>,
    %315 = vector.extract_strided_slice %258 {offsets = [0, 271], sizes = [4, 16], strides = [1, 1]} : vector<8x384xf32> to vector<4x16xf32>
    %c0_204 = arith.constant 0 : index
    %c0_205 = arith.constant 0 : index
    %c224 = arith.constant 224 : index
    %316 = vector.load %arg9[%c0_204, %c0_205, %c224] : memref<1x4x256xf32, #tpu.memory_space<vmem>>, vector<1x4x16xf32>
    %317 = vector.shape_cast %316 : vector<1x4x16xf32> to vector<4x16xf32>
    %318 = vector.shape_cast %315 : vector<4x16xf32> to vector<1x4x16xf32>
    tpu.vector_store %arg9[%c0_204, %c0_205, %c224], %318 {strides = array<i32>} : memref<1x4x256xf32, #tpu.memory_space<vmem>>, vector<1x4x16xf32>,
    %319 = vector.extract_strided_slice %258 {offsets = [0, 289], sizes = [4, 16], strides = [1, 1]} : vector<8x384xf32> to vector<4x16xf32>
    %c0_206 = arith.constant 0 : index
    %c0_207 = arith.constant 0 : index
    %c240 = arith.constant 240 : index
    %320 = vector.load %arg9[%c0_206, %c0_207, %c240] : memref<1x4x256xf32, #tpu.memory_space<vmem>>, vector<1x4x16xf32>
    %321 = vector.shape_cast %320 : vector<1x4x16xf32> to vector<4x16xf32>
    %322 = vector.shape_cast %319 : vector<4x16xf32> to vector<1x4x16xf32>
    tpu.vector_store %arg9[%c0_206, %c0_207, %c240], %322 {strides = array<i32>} : memref<1x4x256xf32, #tpu.memory_space<vmem>>, vector<1x4x16xf32>,
    return
  }
  func.func @transform_0(%arg0: i32) -> (i32, i32, i32) {
    %c0_i32 = arith.constant 0 : i32
    %c0_i32_0 = arith.constant 0 : i32
    %c0_i32_1 = arith.constant 0 : i32
    return %arg0, %c0_i32, %c0_i32_0 : i32, i32, i32
  }
  func.func @transform_1(%arg0: i32) -> (i32, i32, i32) {
    %c0_i32 = arith.constant 0 : i32
    %c0_i32_0 = arith.constant 0 : i32
    %c0_i32_1 = arith.constant 0 : i32
    return %arg0, %c0_i32, %c0_i32_0 : i32, i32, i32
  }
  func.func @transform_2(%arg0: i32) -> (i32, i32) {
    %c0_i32 = arith.constant 0 : i32
    %c0_i32_0 = arith.constant 0 : i32
    %c0_i32_1 = arith.constant 0 : i32
    return %c0_i32, %c0_i32_0 : i32, i32
  }
  func.func @transform_3(%arg0: i32) -> (i32, i32) {
    %c0_i32 = arith.constant 0 : i32
    %c0_i32_0 = arith.constant 0 : i32
    %c0_i32_1 = arith.constant 0 : i32
    return %c0_i32, %c0_i32_0 : i32, i32
  }
  func.func @transform_4(%arg0: i32) -> (i32, i32, i32) {
    %c0_i32 = arith.constant 0 : i32
    %c0_i32_0 = arith.constant 0 : i32
    %c0_i32_1 = arith.constant 0 : i32
    %c0_i32_2 = arith.constant 0 : i32
    return %c0_i32, %c0_i32_0, %c0_i32_1 : i32, i32, i32
  }
  func.func @transform_5(%arg0: i32) -> (i32, i32) {
    %c0_i32 = arith.constant 0 : i32
    %c0_i32_0 = arith.constant 0 : i32
    %c0_i32_1 = arith.constant 0 : i32
    return %c0_i32, %c0_i32_0 : i32, i32
  }
  func.func @transform_6(%arg0: i32) -> (i32, i32, i32) {
    %c0_i32 = arith.constant 0 : i32
    %c0_i32_0 = arith.constant 0 : i32
    %c0_i32_1 = arith.constant 0 : i32
    %c0_i32_2 = arith.constant 0 : i32
    return %c0_i32, %c0_i32_0, %c0_i32_1 : i32, i32, i32
  }
  func.func @transform_7(%arg0: i32) -> (i32, i32) {
    %c0_i32 = arith.constant 0 : i32
    %c0_i32_0 = arith.constant 0 : i32
    %c0_i32_1 = arith.constant 0 : i32
    return %c0_i32, %c0_i32_0 : i32, i32
  }
  func.func @transform_8(%arg0: i32) -> (i32, i32, i32) {
    %c0_i32 = arith.constant 0 : i32
    %c0_i32_0 = arith.constant 0 : i32
    %c0_i32_1 = arith.constant 0 : i32
    return %arg0, %c0_i32, %c0_i32_0 : i32, i32, i32
  }
}

</mosaic_0001>

<bundles_post_ra>
// kernel: unet_up_forward.1
= control target key start
LH: loop header
LB: loop body
LE: loop exit
PB: predicated region body
PF: predicated region fallthrough
CT: control target
= control target key end

     0   :  { %s3901_s27 = smov 0   ;;  %s4529_s0 = inlined_call_operand.vmem [shape: f32[2,4,256], index: 0, kind: input, shape index: {}]   ;;  %s4530_s1 = inlined_call_operand.vmem [shape: f32[2,4,64], index: 1, kind: input, shape index: {}]   ;;  %s4531_s2 = inlined_call_operand.vmem [shape: f32[8,16], index: 2, kind: input, shape index: {}]   ;;  %s4532_s3 = inlined_call_operand.vmem [shape: f32[1,384], index: 3, kind: input, shape index: {}]   ;;  %s4533_s4 = inlined_call_operand.vmem [shape: bf16[9,8,16], index: 4, kind: input, shape index: {}]   ;;  %s4534_s5 = inlined_call_operand.vmem [shape: f32[8,1], index: 5, kind: input, shape index: {}]   ;;  %s4535_s6 = inlined_call_operand.vmem [shape: bf16[9,8,8], index: 6, kind: input, shape index: {}]   ;;  %s4536_s7 = inlined_call_operand.vmem [shape: f32[8,1], index: 7, kind: input, shape index: {}]   ;;  %s4537_s8 = inlined_call_operand.vmem [shape: f32[2,4,256], index: 8, kind: output, shape index: {}]  }
   0x1 LB: > { %s3286_s28 = sadd.s32 4294967295, %s3800_s27   ;;  %p3290_p0 = scmp.ge.s32.totalorder %s3800_s27, 1  ;;  %s3800_s27 = sphi %s3901_s27, %s18_s27  }
   0x2   : > { %p271_p1 = scmp.lt.s32.totalorder %s3800_s27, 3 }
   0x4   : > { %p272_p2 = pnand %p3290_p0, %p271_p1 }
   0x5   : > { %p309_p3 = scmp.lt.s32.totalorder (!%p272_p2), %s3286_s28, 1  ;;  %v3912_v0 = vld [vmem:[%s4531_s2] sm:$0xff] (!%p272_p2)  ;;  %v3802_v1 = vmov (!%p272_p2), 0.0   ;;  %vm4539_vm0 = vmmov (!%p272_p2), 0   ;;  %vm4538_vm1 = vcmask (!%p272_p2), 64512   ;;  %s3804_s13 = smov (!%p272_p2), 120  }
   0x6   : > { %275 = sbr.rel (%p272_p2) target bundleno = 1478 (0x5c6), region = 52  ;;  %3421 = vmatprep.subr.mxu0 (!%p272_p2), %v3802_v1  ;;  %324 = vst [vmem:[#allocation2] sm:$0xff] (!%p272_p2), %v3802_v1  ;;  %325 = vst [vmem:[#allocation2 + $0x8] sm:$0xff] (!%p272_p2), %v3802_v1  ;;  %3423 = vmatprep.mubr.msk.f32.mxu0 (!%p272_p2), %vm4539_vm0, %v3802_v1  ;;  %s3805_s14 = smov (!%p272_p2), 104   ;;  %vm367_vm2 = vcmask (!%p272_p2), 117760   ;;  %vm335_vm3 = vcmask (!%p272_p2), 281752  }
   0x7   : > { %326 = vst [vmem:[#allocation2 + $0x10] sm:$0xff] (!%p272_p2), %v3802_v1  ;;  %327 = vst [vmem:[#allocation2 + $0x18] sm:$0xff] (!%p272_p2), %v3802_v1  ;;  %3422 = vmatpush3.msra.mxu0 (!%p272_p2), %v3912_v0  ;;  %3426 = vmatprep.subr.mxu1 (!%p272_p2), %v3802_v1  ;;  %s3806_s16 = smov (!%p272_p2), 112   ;;  %s3807_s17 = smov (!%p272_p2), 96   ;;  %vm372_vm4 = vcmask (!%p272_p2), 265352   ;;  %vm378_vm5 = vcmask (!%p272_p2), 412952  }
   0x8   : > { %328 = vst [vmem:[#allocation2 + $0x20] sm:$0xff] (!%p272_p2), %v3802_v1  ;;  %329 = vst [vmem:[#allocation2 + $0x28] sm:$0xff] (!%p272_p2), %v3802_v1  ;;  %3427 = vmatpush3.msra.mxu1 (!%p272_p2), %v3912_v0  ;;  %3428 = vmatprep.mubr.msk.f32.mxu1 (!%p272_p2), %vm4539_vm0, %v3802_v1  ;;  %s3808_s21 = smov (!%p272_p2), 88   ;;  %s3809_s22 = smov (!%p272_p2), 80   ;;  %vm340_vm6 = vcmask (!%p272_p2), 429352   ;;  %vm383_vm7 = vcmask (!%p272_p2), 560552  }
   0x9   : > { %3431 = vmatprep.subr.mxu0 (!%p272_p2), %v3802_v1  ;;  %3436 = vmatprep.subr.mxu1 (!%p272_p2), %v3802_v1  ;;  %s3810_s23 = smov (!%p272_p2), 72   ;;  %s3811_s24 = smov (!%p272_p2), 31   ;;  %vm345_vm8 = vcmask (!%p272_p2), 576952   ;;  %vm4541_vm9 = vcmask (!%p272_p2), 708152   ;;  %vm350_vm10 = vcmask (!%p272_p2), 724552   ;;  %vm355_vm11 = vcmask (!%p272_p2), 872152  }
   0xa   : > { %s3812_s25 = smov (!%p272_p2), 19   ;;  %s3813_s26 = smov (!%p272_p2), 33   ;;  %vm360_vm12 = vcmask (!%p272_p2), 1019752   ;;  %vm365_vm13 = vcmask (!%p272_p2), 1044472   ;;  %vm405_vm14 = vcmask (!%p272_p2), 101376   ;;  %vm410_vm15 = vcmask (!%p272_p2), 248952  }
   0xb   : > { %s3814_s29 = smov (!%p272_p2), 21   ;;  %s3815_s30 = smov (!%p272_p2), 35  }
   0xc   : > { %s3817_s10 = smov (!%p272_p2), 37   ;;  %s3818_s11 = smov (!%p272_p2), 25  }
   0xd   : > { %s4563_s28 = smov (!%p309_p3, %s3286_s28), 1  ;;  %s3824_s18 = smov 41  }
   0xe   : > { %s3293_s9 = sshll.u32 %s4563_s28, 2  ;;  %s3367_s15 = sshll.u32 %s4563_s28, 3 }
   0xf   : > { %s317_s12 = scalar_lea.vmem %s4530_s1, %s3293_s9  ;;  %s313_s20 = scalar_lea.vmem %s4529_s0, %s3367_s15 }
  0x10   : > { %v417_v2 = vld [vmem:[%s317_s12] sm:$0xf]  ;;  %s3816_s9 = smov 23   ;;  %s3819_s12 = smov 39  }
  0x11   : > { %493 = vrot.lane.b32.xlu0 %v417_v2, %s3804_s13  ;;  %641 = vrot.lane.b32.xlu1 %v417_v2, %s3805_s14  ;;  %v330_v3 = vld [vmem:[%s313_s20] sm:$0xff]  ;;  %s3820_s13 = smov 27   ;;  %s3821_s14 = smov 29  }
  0x12   : > { %3424 = vmatmul.mubr.msk.f32.vlgmr.msra.gmra.mrb[0].mxu0 %vm4538_vm1, %v417_v2  ;;  %v3949_v4 = vcombine.high %v330_v3, %v330_v3  ;;  %s3825_s19 = smov 43   ;;  %s3826_s20 = smov 55  }
  0x13   : > { %3432 = vmatpush3.msra.mxu0 %v3912_v0  ;;  %3433 = vmatprep.mubr.msk.f32.mxu0 %vm4539_vm0, %v3802_v1 }
  0x14   : > { %3441 = vmatprep.subr.mxu0 %v3802_v1 }
  0x15   : > { %567 = vrot.lane.b32.xlu0 %v417_v2, %s3806_s16  ;;  %715 = vrot.lane.b32.xlu1 %v417_v2, %s3807_s17  ;;  %s3822_s16 = smov 45   ;;  %s3823_s17 = smov 47  }
  0x19   : > { %789 = vrot.lane.b32.xlu0 %v417_v2, %s3808_s21  ;;  %863 = vrot.lane.b32.xlu1 %v417_v2, %s3809_s22  ;;  %s3827_s21 = smov 127   ;;  %s3828_s22 = smov 73  }
  0x1d   : > { %937 = vrot.lane.b32.xlu0 %v417_v2, %s3810_s23  ;;  %362 = vrot.lane.b32.xlu1 %v330_v3, %s3811_s24  ;;  %s3829_s23 = smov 17   ;;  %s3830_s24 = smov 91  }
  0x21   : > { %332 = vrot.lane.b32.xlu1 %v330_v3, %s3812_s25  ;;  %369 = vrot.lane.b32.xlu0 %v330_v3, %s3813_s26 }
  0x25   : > { %337 = vrot.lane.b32.xlu1 %v330_v3, %s3814_s29  ;;  %375 = vrot.lane.b32.xlu0 %v3949_v4, %s3815_s30  ;;  %s3831_s29 = smov 107  }
  0x29   : > { %342 = vrot.lane.b32.xlu1 %v330_v3, %s3816_s9  ;;  %380 = vrot.lane.b32.xlu0 %v3949_v4, %s3817_s10  ;;  %s3832_s9 = smov 109  }
  0x2d   : > { %347 = vrot.lane.b32.xlu1 %v330_v3, %s3818_s11  ;;  %385 = vrot.lane.b32.xlu0 %v3949_v4, %s3819_s12  ;;  %s3834_s11 = smov 53   ;;  %s3835_s12 = smov 71  }
  0x31   : > { %352 = vrot.lane.b32.xlu1 %v330_v3, %s3820_s13  ;;  %390 = vrot.lane.b32.xlu0 %v3949_v4, %s3824_s18  ;;  %s3836_s13 = smov 89   ;;  %s3843_s18 = smov 110  }
  0x35   : > { %357 = vrot.lane.b32.xlu1 %v330_v3, %s3821_s14  ;;  %395 = vrot.lane.b32.xlu0 %v3949_v4, %s3825_s19  ;;  %s3837_s14 = smov 125   ;;  %s3848_s19 = smov 99  }
  0x39   : > { %400 = vrot.lane.b32.xlu1 %v3949_v4, %s3822_s16  ;;  %s3838_s16 = smov 15  }
  0x3d   : > { %407 = vrot.lane.b32.xlu1 %v3949_v4, %s3823_s17  ;;  %s3842_s17 = smov 111  }
  0x83   : > { %v494_v5 = vpop.permute.xlu0 %493  ;;  %v642_v6 = vpop.permute.xlu1 %641 }
  0x84   : > { %3429 = vmatmul.mubr.msk.f32.vlgmr.msra.gmra.mrb[0].mxu1 %vm4538_vm1, %v494_v5 }
  0x85   : > { %3437 = vmatpush3.msra.mxu1 %v3912_v0  ;;  %3438 = vmatprep.mubr.msk.f32.mxu1 %vm4539_vm0, %v3802_v1 }
  0x86   : > { %3446 = vmatprep.subr.mxu1 %v3802_v1 }
  0x87   : > { %v568_v7 = vpop.permute.xlu0 %567  ;;  %v716_v8 = vpop.permute.xlu1 %715 }
  0x88   : > { %3434 = vmatmul.mubr.msk.f32.vlgmr.msra.gmra.mrb[2].mxu0 %vm4538_vm1, %v568_v7  ;;  %3439 = vmatmul.mubr.msk.f32.vlgmr.msra.gmra.mrb[2].mxu1 %vm4538_vm1, %v642_v6 }
  0x89   : > { %3447 = vmatpush3.msra.mxu1 %v3912_v0  ;;  %3448 = vmatprep.mubr.msk.f32.mxu1 %vm4539_vm0, %v3802_v1 }
  0x8a   : > { %3442 = vmatpush3.msra.mxu0 %v3912_v0  ;;  %3443 = vmatprep.mubr.msk.f32.mxu0 %vm4539_vm0, %v3802_v1 }
  0x8b   : > { %v790_v9 = vpop.permute.xlu0 %789  ;;  %3451 = vmatprep.subr.mxu0 %v3802_v1  ;;  %3456 = vmatprep.subr.mxu1 %v3802_v1  ;;  %v864_v10 = vpop.permute.xlu1 %863 }
  0x8c   : > { %3444 = vmatmul.mubr.msk.f32.vlgmr.msra.gmra.mrb[4].mxu0 %vm4538_vm1, %v716_v8  ;;  %3449 = vmatmul.mubr.msk.f32.vlgmr.msra.gmra.mrb[4].mxu1 %vm4538_vm1, %v790_v9 }
  0x8d   : > { %3452 = vmatpush3.msra.mxu0 %v3912_v0  ;;  %3453 = vmatprep.mubr.msk.f32.mxu0 %vm4539_vm0, %v3802_v1 }
  0x8e   : > { %3457 = vmatpush3.msra.mxu1 %v3912_v0  ;;  %3458 = vmatprep.mubr.msk.f32.mxu1 %vm4539_vm0, %v3802_v1 }
  0x8f   : > { %v938_v11 = vpop.permute.xlu0 %937  ;;  %3461 = vmatprep.subr.bf16.mxu1 %v3802_v1  ;;  %v363_v14 = vpop.permute.xlu1 %362 }
  0x90   : > { %3454 = vmatmul.mubr.msk.f32.vlgmr.msra.gmra.mrb[6].mxu0 %vm4538_vm1, %v864_v10  ;;  %3459 = vmatmul.mubr.msk.f32.vlgmr.msra.gmra.mrb[6].mxu1 %vm4538_vm1, %v938_v11  ;;  %368 = vst.msk [vmem:[#allocation2 + $0x8] sm:$0xf] %vm367_vm2, %v363_v14  ;;  %vm393_vm1 = vcmask 855752  }
  0x91   : > { %3463 = vmatprep.mubr.msk.bf16.mxu1 %vm4539_vm0, %v3802_v1  ;;  %vm398_vm0 = vcmask 1003352  }
  0x93   : > { %v370_v15 = vpop.permute.xlu0 %369  ;;  %v333_v16 = vpop.permute.xlu1 %332 }
  0x94   : > { %373 = vst.msk [vmem:[#allocation2 + $0x8] sm:$0xf] %vm372_vm4, %v370_v15 }
  0x95   : > { %336 = vst.msk [vmem:[#allocation2] sm:$0xf] %vm335_vm3, %v333_v16 }
  0x97   : > { %v376_v17 = vpop.permute.xlu0 %375  ;;  %v338_v18 = vpop.permute.xlu1 %337 }
  0x98   : > { %379 = vst.msk [vmem:[#allocation2 + $0x8] sm:$0xf] %vm378_vm5, %v376_v17 }
  0x99   : > { %341 = vst.msk [vmem:[#allocation2] sm:$0xf] %vm340_vm6, %v338_v18 }
  0x9b   : > { %v381_v19 = vpop.permute.xlu0 %380  ;;  %v343_v20 = vpop.permute.xlu1 %342 }
  0x9c   : > { %384 = vst.msk [vmem:[#allocation2 + $0x8] sm:$0xf] %vm383_vm7, %v381_v19 }
  0x9d   : > { %346 = vst.msk [vmem:[#allocation2] sm:$0xf] %vm345_vm8, %v343_v20 }
  0x9f   : > { %v386_v21 = vpop.permute.xlu0 %385  ;;  %v348_v22 = vpop.permute.xlu1 %347 }
  0xa0   : > { %389 = vst.msk [vmem:[#allocation2 + $0x8] sm:$0xf] %vm4541_vm9, %v386_v21  ;;  %vm403_vm9 = vcmask 1044456  }
  0xa1   : > { %351 = vst.msk [vmem:[#allocation2] sm:$0xf] %vm350_vm10, %v348_v22 }
  0xa3   : > { %v353_v23 = vpop.permute.xlu1 %352  ;;  %v391_v27 = vpop.permute.xlu0 %390 }
  0xa4   : > { %356 = vst.msk [vmem:[#allocation2] sm:$0xf] %vm355_vm11, %v353_v23 }
  0xa5   : > { %394 = vst.msk [vmem:[#allocation2 + $0x8] sm:$0xf] %vm393_vm1, %v391_v27 }
  0xa7   : > { %v358_v24 = vpop.permute.xlu1 %357  ;;  %v396_v28 = vpop.permute.xlu0 %395 }
  0xa8   : > { %361 = vst.msk [vmem:[#allocation2] sm:$0xf] %vm360_vm12, %v358_v24 }
  0xa9   : > { %366 = vst.msk [vmem:[#allocation2] sm:$0xf] %vm365_vm13, %v363_v14 }
  0xaa   : > { %399 = vst.msk [vmem:[#allocation2 + $0x8] sm:$0xf] %vm398_vm0, %v396_v28 }
  0xab   : > { %v401_v25 = vpop.permute.xlu1 %400 }
  0xac   : > { %406 = vst.msk [vmem:[#allocation2 + $0x10] sm:$0xf] %vm405_vm14, %v401_v25 }
  0xad   : > { %404 = vst.msk [vmem:[#allocation2 + $0x8] sm:$0xf] %vm403_vm9, %v401_v25 }
  0xaf   : > { %v408_v26 = vpop.permute.xlu1 %407 }
  0xb0   : > { %411 = vst.msk [vmem:[#allocation2 + $0x10] sm:$0xf] %vm410_vm15, %v408_v26 }
  0xe5   : > { %v489_v12 = vpop.f32.mrb[0].mxu0 }
  0xe6   : > { %v3425_v13 = vpop.f32.mrb[1].mxu0  ;;  %1012 = vrot.lane.b32.xlu1 %v489_v12, %s3812_s25  ;;  %v1016_v29 = vmul.f32 0.53333336, %v489_v12  ;;  %v1024_v30 = vmul.f32 0.06666667, %v489_v12 }
 0x157   : > { %v563_v31 = vpop.f32.mrb[0].mxu1 }
 0x158   : > { %v1017_v32 = vmul.f32 0.46666667, %v563_v31  ;;  %v1025_v33 = vmul.f32 0.93333334, %v563_v31  ;;  %v1013_v34 = vpop.permute.xlu1 %1012  ;;  %v3430_v35 = vpop.f32.mrb[1].mxu1 }
 0x159   : > { %1015 = vst.msk [vmem:[#allocation2 + $0x18] sm:$0xf] %vm335_vm3, %v1013_v34  ;;  %v1032_v38 = vmul.f32 0.6, %v563_v31  ;;  %v1040_v39 = vmul.f32 0.13333334, %v563_v31 }
 0x15a   : > { %v1018_v36 = vadd.f32 %v1017_v32, %v1016_v29  ;;  %v1026_v37 = vadd.f32 %v1025_v33, %v1024_v30  ;;  %vm415_vm3 = vcmask 396552   ;;  %v4029_v35 = vld [vmem:[#allocation2] sm:$0xff] }
 0x15b   : > { %v637_v40 = vpop.f32.mrb[2].mxu0  ;;  %v711_v41 = vpop.f32.mrb[2].mxu1 }
 0x15c   : > { %v1033_v42 = vmul.f32 0.4, %v637_v40  ;;  %v1041_v43 = vmul.f32 0.8666667, %v637_v40  ;;  %v1048_v44 = vmul.f32 0.6666667, %v637_v40  ;;  %1020 = vrot.lane.b32.xlu1 %v1018_v36, %s3817_s10 }
 0x15d   : > { %v1056_v45 = vmul.f32 0.2, %v637_v40  ;;  %v1049_v46 = vmul.f32 0.33333334, %v711_v41  ;;  %v1057_v47 = vmul.f32 0.8, %v711_v41 }
 0x15e   : > { %v3435_v48 = vpop.f32.mrb[3].mxu0  ;;  %v3440_v49 = vpop.f32.mrb[3].mxu1  ;;  %v1034_v50 = vadd.f32 %v1033_v42, %v1032_v38  ;;  %v1042_v51 = vadd.f32 %v1041_v43, %v1040_v39  ;;  %v1065_v52 = vmul.f32 0.73333335, %v711_v41  ;;  %v1073_v53 = vmul.f32 0.26666668, %v711_v41 }
 0x15f   : > { %v785_v54 = vpop.f32.mrb[4].mxu0  ;;  %v859_v55 = vpop.f32.mrb[4].mxu1  ;;  %v1058_v56 = vadd.f32 %v1057_v47, %v1056_v45  ;;  %v1050_v57 = vadd.f32 %v1049_v46, %v1048_v44  ;;  %s3833_s10 = smov 49   ;;  %v4043_v43 = vld [vmem:[#allocation2 + $0x8] sm:$0xff]  ;;  %v3840_v48 = vmov 0  }
 0x160   : > { %v1066_v58 = vmul.f32 0.26666668, %v785_v54  ;;  %v1074_v59 = vmul.f32 0.73333335, %v785_v54  ;;  %v1081_v60 = vmul.f32 0.8, %v785_v54  ;;  %1028 = vrot.lane.b32.xlu1 %v1026_v37, %s3826_s20  ;;  %1228 = vmatprep.mubr.bf16.mxu0 %v3840_v48 }
 0x161   : > { %v1089_v61 = vmul.f32 0.33333334, %v785_v54  ;;  %v1082_v62 = vmul.f32 0.2, %v859_v55  ;;  %v1090_v63 = vmul.f32 0.6666667, %v859_v55  ;;  %1060 = vrot.lane.b32.xlu0 %v1058_v56, %s3827_s21  ;;  %3751 = vset.pattern.permute.xlu1 %v3840_v48 }
 0x162   : > { %v1097_v0 = vmul.f32 0.8666667, %v859_v55  ;;  %v1105_v2 = vmul.f32 0.4, %v859_v55  ;;  %v3445_v3 = vpop.f32.mrb[5].mxu0  ;;  %v1067_v5 = vadd.f32 %v1066_v58, %v1065_v52  ;;  %v1075_v6 = vadd.f32 %v1074_v59, %v1073_v53  ;;  %v3450_v7 = vpop.f32.mrb[5].mxu1  ;;  %3792 = vset.pattern.permute.xlu0 %v3840_v48 }
 0x163   : > { %v933_v8 = vpop.f32.mrb[6].mxu0  ;;  %v1083_v9 = vadd.f32 %v1082_v62, %v1081_v60  ;;  %v1007_v10 = vpop.f32.mrb[6].mxu1  ;;  %v1091_v11 = vadd.f32 %v1090_v63, %v1089_v61  ;;  %v1142_v52 = vld [vmem:[%s4534_s5] sm:$0xff]  ;;  %v1155_v53 = vlaneseq  ;;  %s3849_s20 = smov 93  }
 0x164   : > { %1036 = vrot.lane.b32.xlu1 %v1034_v50, %s3828_s22  ;;  %v1098_v12 = vmul.f32 0.13333334, %v933_v8  ;;  %v1106_v13 = vmul.f32 0.6, %v933_v8  ;;  %v1113_v14 = vmul.f32 0.93333334, %v933_v8 }
 0x165   : > { %1069 = vrot.lane.b32.xlu0 %v1067_v5, %s3829_s23  ;;  %v1122_v15 = vmul.f32 0.46666667, %v933_v8  ;;  %v3455_v16 = vpop.f32.mrb[7].mxu0  ;;  %v1114_v17 = vmul.f32 0.06666667, %v1007_v10  ;;  %v3460_v18 = vpop.f32.mrb[7].mxu1 }
 0x166   : > { %v1107_v19 = vadd.f32 %v1106_v13, %v1105_v2  ;;  %v1123_v20 = vmul.f32 0.53333336, %v1007_v10  ;;  %v1099_v21 = vadd.f32 %v1098_v12, %v1097_v0  ;;  %v4090_v54 = vand.u32 127, %v1155_v53  ;;  %s3852_s22 = smov 87  }
 0x167   : > { %v1115_v22 = vadd.f32 %v1114_v17, %v1113_v14 }
 0x168   : > { %1044 = vrot.lane.b32.xlu1 %v1042_v51, %s3830_s24  ;;  %v1124_v23 = vadd.f32 %v1123_v20, %v1122_v15 }
 0x169   : > { %1077 = vrot.lane.b32.xlu0 %v1075_v6, %s3815_s30  ;;  %s3841_s30 = smov 1  }
 0x16c   : > { %1109 = vrot.lane.b32.xlu1 %v1107_v19, %s3831_s29 }
 0x16d   : > { %1052 = vrot.lane.b32.xlu0 %v1050_v57, %s3832_s9 }
 0x170   : > { %412 = vrot.lane.b32.xlu1 %v3949_v4, %s3833_s10  ;;  %s3853_s10 = smov 95  }
 0x171   : > { %1085 = vrot.lane.b32.xlu0 %v1083_v9, %s3834_s11  ;;  %s3854_s11 = smov 85  }
 0x175   : > { %1093 = vrot.lane.b32.xlu0 %v1091_v11, %s3835_s12  ;;  %s3855_s12 = smov 79  }
 0x179   : > { %1101 = vrot.lane.b32.xlu0 %v1099_v21, %s3836_s13 }
 0x17d   : > { %1117 = vrot.lane.b32.xlu0 %v1115_v22, %s3837_s14  ;;  %s3846_s14 = smov 101  }
 0x181   : > { %1126 = vrot.lane.b32.xlu0 %v1124_v23, %s3838_s16  ;;  %v3304_v23 = vld [vmem:[%s4533_s4 + $0x4] sm:$0xf]  ;;  %s3847_s16 = smov 81  }
 0x185   : > { %1131 = vrot.lane.b32.xlu0 %v1007_v10, %s3813_s26  ;;  %s3839_s26 = smov 18  }
 0x1ce   : > { %v1021_v24 = vpop.permute.xlu1 %1020 }
 0x1cf   : > { %1023 = vst.msk [vmem:[#allocation2 + $0x18] sm:$0xf] %vm340_vm6, %v1021_v24  ;;  %vm4543_vm6 = vmmov 0  }
 0x1d2   : > { %v1029_v25 = vpop.permute.xlu1 %1028 }
 0x1d3   : > { %1031 = vst.msk [vmem:[#allocation2 + $0x18] sm:$0xf] %vm345_vm8, %v1029_v25  ;;  %v1061_v4 = vpop.permute.xlu0 %1060  ;;  %vm1687_vm8 = vcmp.lt.s32.totalorder %v4090_v54, 127 }
 0x1d4   : > { %1064 = vst.msk [vmem:[#allocation2 + $0x20] sm:$0xf] %vm367_vm2, %v1061_v4  ;;  %vm4542_vm2 = vcmask 708152  }
 0x1d6   : > { %v1037_v26 = vpop.permute.xlu1 %1036 }
 0x1d7   : > { %1039 = vst.msk [vmem:[#allocation2 + $0x18] sm:$0xf] %vm350_vm10, %v1037_v26  ;;  %v1070_v27 = vpop.permute.xlu0 %1069  ;;  %vm1909_vm10 = vcmp.lt.s32.totalorder %v4090_v54, 110 }
 0x1d8   : > { %1072 = vst.msk [vmem:[#allocation2 + $0x20] sm:$0xf] %vm372_vm4, %v1070_v27  ;;  %vm1192_vm4 = vcmask 130048  }
 0x1da   : > { %v1045_v28 = vpop.permute.xlu1 %1044 }
 0x1db   : > { %1047 = vst.msk [vmem:[#allocation2 + $0x18] sm:$0xf] %vm355_vm11, %v1045_v28  ;;  %v1078_v29 = vpop.permute.xlu0 %1077  ;;  %vm2020_vm11 = vcmp.lt.s32.totalorder %v4090_v54, 109 }
 0x1dc   : > { %1080 = vst.msk [vmem:[#allocation2 + $0x20] sm:$0xf] %vm378_vm5, %v1078_v29  ;;  %vm1373_vm5 = vcmp.lt.s32.totalorder %v4090_v54, 17 }
 0x1de   : > { %v1110_v30 = vpop.permute.xlu1 %1109 }
 0x1df   : > { %v1053_v31 = vpop.permute.xlu0 %1052 }
 0x1e0   : > { %1055 = vst.msk [vmem:[#allocation2 + $0x18] sm:$0xf] %vm360_vm12, %v1053_v31  ;;  %vm2180_vm12 = vcmask 1043456  }
 0x1e1   : > { %1063 = vst.msk [vmem:[#allocation2 + $0x18] sm:$0xf] %vm365_vm13, %v1061_v4  ;;  %vm4544_vm13 = vcmask 64512  }
 0x1e2   : > { %v413_v32 = vpop.permute.xlu1 %412 }
 0x1e3   : > { %v1086_v33 = vpop.permute.xlu0 %1085  ;;  %416 = vst.msk [vmem:[#allocation2 + $0x10] sm:$0xf] %vm415_vm3, %v413_v32 }
 0x1e4   : > { %1088 = vst.msk [vmem:[#allocation2 + $0x20] sm:$0xf] %vm383_vm7, %v1086_v33  ;;  %vm1484_vm7 = vcmp.lt.s32.totalorder %v4090_v54, 1 }
 0x1e7   : > { %v1094_v34 = vpop.permute.xlu0 %1093 }
 0x1e8   : > { %1096 = vst.msk [vmem:[#allocation2 + $0x20] sm:$0xf] %vm4542_vm2, %v1094_v34  ;;  %v4031_v36 = vld [vmem:[#allocation2 + $0x18] sm:$0xff] }
 0x1e9   : > { %v3631_v37 = vpack.i.bf16 %v4031_v36, %v4029_v35  ;;  %v1585_v39 = vpack.c.bf16 %v4031_v36, %v4029_v35 }
 0x1ea   : > { %v4053_v47 = vld [vmem:[#allocation2 + $0x10] sm:$0xff] }
 0x1eb   : > { %3632 = vrot.lane.b32.xlu1 %v3631_v37, %s3839_s26  ;;  %v1102_v38 = vpop.permute.xlu0 %1101 }
 0x1ec   : > { %1104 = vst.msk [vmem:[#allocation2 + $0x20] sm:$0xf] %vm393_vm1, %v1102_v38  ;;  %vm1157_vm1 = vcmp.lt.s32.totalorder %v4090_v54, 19 }
 0x1ed   : > { %1112 = vst.msk [vmem:[#allocation2 + $0x20] sm:$0xf] %vm398_vm0, %v1110_v30  ;;  %vm1180_vm0 = vcmp.lt.s32.totalorder %v4090_v54, 18 }
 0x1ef   : > { %v1118_v40 = vpop.permute.xlu0 %1117 }
 0x1f0   : > { %1120 = vst.msk [vmem:[#allocation2 + $0x20] sm:$0xf] %vm403_vm9, %v1118_v40  ;;  %vm1798_vm9 = vcmp.lt.s32.totalorder %v4090_v54, 111 }
 0x1f1   : > { %1121 = vst.msk [vmem:[#allocation2 + $0x28] sm:$0xf] %vm405_vm14, %v1118_v40  ;;  %vm4545_vm14 = vmmov %vm4544_vm13 }
 0x1f3   : > { %v1127_v41 = vpop.permute.xlu0 %1126 }
 0x1f4   : > { %1129 = vst.msk [vmem:[#allocation2 + $0x28] sm:$0xf] %vm410_vm15, %v1127_v41  ;;  %vm4546_vm15 = vmmov %vm4544_vm13 }
 0x1f7   : > { %v1132_v42 = vpop.permute.xlu0 %1131  ;;  %v4045_v44 = vld [vmem:[#allocation2 + $0x20] sm:$0xff] }
 0x1f8   : > { %1134 = vst.msk [vmem:[#allocation2 + $0x28] sm:$0xf] %vm415_vm3, %v1132_v42  ;;  %v3636_v45 = vpack.i.bf16 %v4045_v44, %v4043_v43  ;;  %v1586_v46 = vpack.c.bf16 %v4045_v44, %v4043_v43  ;;  %vm4547_vm3 = vmmov %vm4544_vm13 }
 0x1f9   : > { %vm4548_vm2 = vmmov %vm4547_vm3 }
 0x1fa   : > { %3637 = vrot.lane.b32.xlu0 %v3636_v45, %s3839_s26 }
 0x1fe   : > { %3647 = vrot.lane.b32.xlu0 %v3631_v37, %s3812_s25 }
 0x1ff   : > { %v4058_v49 = vld [vmem:[#allocation2 + $0x28] sm:$0xff] }
 0x200   : > { %v3656_v50 = vpack.i.bf16 %v4058_v49, %v4053_v47  ;;  %v1587_v51 = vpack.c.bf16 %v4058_v49, %v4053_v47  ;;  %v3315_v49 = vld [vmem:[%s4533_s4 + $0x10] sm:$0xf] }
 0x202   : > { %3657 = vrot.lane.b32.xlu0 %v3656_v50, %s3812_s25  ;;  %3642 = vrot.lane.b32.xlu1 %v3656_v50, %s3839_s26 }
 0x206   : > { %3667 = vrot.lane.b32.xlu0 %v3636_v45, %s3829_s23  ;;  %3652 = vrot.lane.b32.xlu1 %v3636_v45, %s3812_s25 }
 0x20a   : > { %3677 = vrot.lane.b32.xlu0 %v3631_v37, %s3841_s30  ;;  %3662 = vrot.lane.b32.xlu1 %v3631_v37, %s3829_s23 }
 0x20e   : > { %3687 = vrot.lane.b32.xlu0 %v3656_v50, %s3841_s30  ;;  %3672 = vrot.lane.b32.xlu1 %v3656_v50, %s3829_s23 }
 0x212   : > { %3697 = vrot.lane.b32.xlu0 %v3656_v50, %s3827_s21  ;;  %3682 = vrot.lane.b32.xlu1 %v3636_v45, %s3841_s30 }
 0x216   : > { %3707 = vrot.lane.b32.xlu0 %v3636_v45, %s3842_s17  ;;  %3692 = vrot.lane.b32.xlu1 %v3636_v45, %s3827_s21 }
 0x21a   : > { %3717 = vrot.lane.b32.xlu0 %v3631_v37, %s3842_s17  ;;  %3702 = vrot.lane.b32.xlu1 %v3631_v37, %s3827_s21 }
 0x21e   : > { %3727 = vrot.lane.b32.xlu0 %v3656_v50, %s3843_s18  ;;  %3712 = vrot.lane.b32.xlu1 %v3656_v50, %s3842_s17 }
 0x222   : > { %3737 = vrot.lane.b32.xlu0 %v3636_v45, %s3832_s9  ;;  %3722 = vrot.lane.b32.xlu1 %v3636_v45, %s3843_s18 }
 0x226   : > { %3747 = vrot.lane.b32.xlu0 %v3631_v37, %s3832_s9  ;;  %3732 = vrot.lane.b32.xlu1 %v3631_v37, %s3843_s18 }
 0x22a   : > { %3742 = vrot.lane.b32.xlu1 %v3656_v50, %s3832_s9 }
 0x22e   : > { %2121 = vperm.xlu1 %3751, %v1142_v52  }
 0x25d   : > { %v3633_v55 = vpop.permute.xlu1 %3632 }
 0x25e   : > { %v3635_v57 = vunpack.i.h.bf16 %v3633_v55  ;;  %v3634_v58 = vunpack.i.l.bf16 %v3633_v55  ;;  %v1164_v55 = vld [vmem:[%s4533_s4] sm:$0xf] }
 0x26c   : > { %v3638_v56 = vpop.permute.xlu0 %3637 }
 0x26d   : > { %v3640_v59 = vunpack.i.h.bf16 %v3638_v56  ;;  %v3639_v60 = vunpack.i.l.bf16 %v3638_v56 }
 0x26f   : > { %v1183_v61 = vsel %vm1180_vm0, %v3634_v58, %v3639_v60  ;;  %v1184_v62 = vsel %vm1180_vm0, %v3635_v57, %v3640_v59 }
 0x270   : > { %v3648_v63 = vpop.permute.xlu0 %3647  ;;  %v1190_v0 = vpack.c.bf16 %v1184_v62, %v1183_v61 }
 0x271   : > { %v3650_v9 = vunpack.i.h.bf16 %v3648_v63  ;;  %v3649_v10 = vunpack.i.l.bf16 %v3648_v63 }
 0x272   : > { %1196 = vmatprep.subr.bf16.mxu0 %v1190_v0 }
 0x274   : > { %v3643_v2 = vpop.permute.xlu1 %3642  ;;  %v3658_v3 = vpop.permute.xlu0 %3657 }
 0x275   : > { %v3645_v5 = vunpack.i.h.bf16 %v3643_v2  ;;  %v3644_v6 = vunpack.i.l.bf16 %v3643_v2  ;;  %v3660_v7 = vunpack.i.h.bf16 %v3658_v3  ;;  %v3659_v8 = vunpack.i.l.bf16 %v3658_v3 }
 0x277   : > { %v1186_v11 = vsel %vm1180_vm0, %v3645_v5, %v3635_v57  ;;  %v1181_v12 = vsel %vm1180_vm0, %v3639_v60, %v3644_v6  ;;  %v1182_v13 = vsel %vm1180_vm0, %v3640_v59, %v3645_v5  ;;  %v1185_v14 = vsel %vm1180_vm0, %v3644_v6, %v3634_v58 }
 0x278   : > { %v1189_v15 = vpack.c.bf16 %v1186_v11, %v1185_v14  ;;  %v1191_v16 = vpack.c.bf16 %v1182_v13, %v1181_v12  ;;  %v3653_v17 = vpop.permute.xlu1 %3652  ;;  %v3668_v18 = vpop.permute.xlu0 %3667  ;;  %v1162_v19 = vsel %vm1157_vm1, %v3659_v8, %v3649_v10  ;;  %v1163_v20 = vsel %vm1157_vm1, %v3660_v7, %v3650_v9 }
 0x279   : > { %v3655_v21 = vunpack.i.h.bf16 %v3653_v17  ;;  %v3654_v22 = vunpack.i.l.bf16 %v3653_v17  ;;  %v1165_v27 = vpack.c.bf16 %v1163_v20, %v1162_v19  ;;  %v3670_v32 = vunpack.i.h.bf16 %v3668_v18 }
 0x27a   : > { %1197 = vmatpush1.bf16.msra.mxu0 %v1189_v15  ;;  %3462 = vmatpush3.bf16.msra.mxu1 %v1191_v16  ;;  %v3669_v33 = vunpack.i.l.bf16 %v3668_v18  ;;  %v3309_v15 = vld [vmem:[%s4533_s4 + $0x8] sm:$0xf] }
 0x27b   : > { %v1158_v24 = vsel %vm1157_vm1, %v3654_v22, %v3659_v8  ;;  %v1159_v25 = vsel %vm1157_vm1, %v3655_v21, %v3660_v7  ;;  %3467 = vmatprep.subr.bf16.mxu1 %v3802_v1  ;;  %v1160_v4 = vsel %vm1157_vm1, %v3649_v10, %v3654_v22  ;;  %v1161_v26 = vsel %vm1157_vm1, %v3650_v9, %v3655_v21 }
 0x27c   : > { %v1167_v28 = vpack.c.bf16 %v1159_v25, %v1158_v24  ;;  %v3663_v29 = vpop.permute.xlu1 %3662  ;;  %v3678_v30 = vpop.permute.xlu0 %3677  ;;  %v1166_v31 = vpack.c.bf16 %v1161_v26, %v1160_v4  ;;  %v3312_v4 = vld [vmem:[%s4533_s4 + $0xc] sm:$0xf] }
 0x27d   : > { %v3665_v34 = vunpack.i.h.bf16 %v3663_v29  ;;  %v3664_v37 = vunpack.i.l.bf16 %v3663_v29  ;;  %3305 = vmatmul.mubr.msk.bf16.vlgmr.msra.gmra.mrb[8].mxu0 %vm1192_vm4, %v3304_v23  ;;  %3464 = vmatmul.mubr.msk.bf16.vlgmr.msra.gmra.mrb[8].mxu1 %vm1192_vm4, %v3304_v23  ;;  %v3680_v60 = vunpack.i.h.bf16 %v3678_v30  ;;  %v3679_v61 = vunpack.i.l.bf16 %v3678_v30 }
 0x27e   : > { %1280 = vmatprep.subr.bf16.mxu0 %v1166_v31  ;;  %3468 = vmatpush3.bf16.msra.mxu1 %v1167_v28 }
 0x27f   : > { %1281 = vmatpush1.bf16.msra.mxu0 %v1165_v27  ;;  %v1376_v38 = vsel %vm1373_vm5, %v3664_v37, %v3669_v33  ;;  %v1377_v40 = vsel %vm1373_vm5, %v3665_v34, %v3670_v32  ;;  %1312 = vmatprep.mubr.bf16.mxu0 %v3840_v48 }
 0x280   : > { %v3673_v41 = vpop.permute.xlu1 %3672  ;;  %v1383_v42 = vpack.c.bf16 %v1377_v40, %v1376_v38  ;;  %3469 = vmatprep.mubr.msk.bf16.mxu1 %vm4543_vm6, %v3802_v1  ;;  %3473 = vmatprep.subr.bf16.mxu1 %v3802_v1  ;;  %v3688_v52 = vpop.permute.xlu0 %3687 }
 0x281   : > { %v3675_v45 = vunpack.i.h.bf16 %v3673_v41  ;;  %v3674_v50 = vunpack.i.l.bf16 %v3673_v41  ;;  %v3690_v2 = vunpack.i.h.bf16 %v3688_v52  ;;  %v3689_v3 = vunpack.i.l.bf16 %v3688_v52 }
 0x282   : > { %1388 = vmatprep.subr.bf16.mxu0 %v1383_v42 }
 0x283   : > { %v1374_v56 = vsel %vm1373_vm5, %v3669_v33, %v3674_v50  ;;  %v1375_v57 = vsel %vm1373_vm5, %v3670_v32, %v3675_v45  ;;  %v1378_v58 = vsel %vm1373_vm5, %v3674_v50, %v3664_v37  ;;  %v1379_v59 = vsel %vm1373_vm5, %v3675_v45, %v3665_v34 }
 0x284   : > { %v1382_v62 = vpack.c.bf16 %v1379_v59, %v1378_v58  ;;  %v1384_v63 = vpack.c.bf16 %v1375_v57, %v1374_v56  ;;  %v3683_v0 = vpop.permute.xlu1 %3682  ;;  %v1489_v11 = vsel %vm1484_vm7, %v3689_v3, %v3679_v61  ;;  %v1490_v12 = vsel %vm1484_vm7, %v3690_v2, %v3680_v60  ;;  %v3698_v16 = vpop.permute.xlu0 %3697 }
 0x285   : > { %v3685_v5 = vunpack.i.h.bf16 %v3683_v0  ;;  %v3684_v6 = vunpack.i.l.bf16 %v3683_v0  ;;  %3307 = vmatmul.mubr.msk.bf16.vlgmr.msra.gmra.mrb[12].mxu0 %vm1192_vm4, %v1164_v55  ;;  %3470 = vmatmul.mubr.msk.bf16.vlgmr.msra.gmra.mrb[12].mxu1 %vm1192_vm4, %v1164_v55  ;;  %v1493_v17 = vpack.c.bf16 %v1490_v12, %v1489_v11  ;;  %v3700_v22 = vunpack.i.h.bf16 %v3698_v16 }
 0x286   : > { %1389 = vmatpush1.bf16.msra.mxu0 %v1382_v62  ;;  %3474 = vmatpush3.bf16.msra.mxu1 %v1384_v63  ;;  %v3699_v23 = vunpack.i.l.bf16 %v3698_v16  ;;  %v3318_v62 = vld [vmem:[%s4533_s4 + $0x14] sm:$0xf] }
 0x287   : > { %v1487_v7 = vsel %vm1484_vm7, %v3679_v61, %v3684_v6  ;;  %v1488_v8 = vsel %vm1484_vm7, %v3680_v60, %v3685_v5  ;;  %1420 = vmatprep.mubr.bf16.mxu0 %v3840_v48  ;;  %3475 = vmatprep.mubr.msk.bf16.mxu1 %vm4543_vm6, %v3802_v1  ;;  %v1485_v13 = vsel %vm1484_vm7, %v3684_v6, %v3689_v3 }
 0x288   : > { %v3693_v9 = vpop.permute.xlu1 %3692  ;;  %v1494_v10 = vpack.c.bf16 %v1488_v8, %v1487_v7  ;;  %3479 = vmatprep.subr.bf16.mxu1 %v3802_v1  ;;  %v1486_v14 = vsel %vm1484_vm7, %v3685_v5, %v3690_v2  ;;  %v3708_v24 = vpop.permute.xlu0 %3707 }
 0x289   : > { %v1495_v18 = vpack.c.bf16 %v1486_v14, %v1485_v13  ;;  %v3695_v20 = vunpack.i.h.bf16 %v3693_v9  ;;  %v3694_v21 = vunpack.i.l.bf16 %v3693_v9  ;;  %v3710_v32 = vunpack.i.h.bf16 %v3708_v24 }
 0x28a   : > { %1499 = vmatprep.subr.bf16.mxu0 %v1494_v10  ;;  %v3709_v33 = vunpack.i.l.bf16 %v3708_v24 }
 0x28b   : > { %v1688_v26 = vsel %vm1687_vm8, %v3694_v21, %v3699_v23  ;;  %v1689_v43 = vsel %vm1687_vm8, %v3695_v20, %v3700_v22 }
 0x28c   : > { %v3703_v19 = vpop.permute.xlu1 %3702  ;;  %v1697_v27 = vpack.c.bf16 %v1689_v43, %v1688_v26  ;;  %v3718_v30 = vpop.permute.xlu0 %3717 }
 0x28d   : > { %3310 = vmatmul.mubr.msk.bf16.vlgmr.msra.gmra.mrb[16].mxu0 %vm1192_vm4, %v3309_v15  ;;  %3476 = vmatmul.mubr.msk.bf16.vlgmr.msra.gmra.mrb[16].mxu1 %vm1192_vm4, %v3309_v15  ;;  %v3705_v44 = vunpack.i.h.bf16 %v3703_v19  ;;  %v3720_v40 = vunpack.i.h.bf16 %v3718_v30  ;;  %v3719_v41 = vunpack.i.l.bf16 %v3718_v30  ;;  %v3327_v30 = vld [vmem:[%s4533_s4 + $0x20] sm:$0xf] }
 0x28e   : > { %1500 = vmatpush1.bf16.msra.mxu0 %v1493_v17  ;;  %3480 = vmatpush3.bf16.msra.mxu1 %v1495_v18 }
 0x28f   : > { %1591 = vmatprep.subr.bf16.mxu0 %v1586_v46  ;;  %1531 = vmatprep.mubr.bf16.mxu0 %v3840_v48  ;;  %v3704_v46 = vunpack.i.l.bf16 %v3703_v19  ;;  %v1691_v36 = vsel %vm1687_vm8, %v3705_v44, %v3695_v20  ;;  %v1693_v47 = vsel %vm1687_vm8, %v3700_v22, %v3705_v44  ;;  %v1801_v58 = vsel %vm1798_vm9, %v3719_v41, %v3709_v33  ;;  %v3321_v19 = vld [vmem:[%s4533_s4 + $0x18] sm:$0xf] }
 0x290   : > { %v3713_v25 = vpop.permute.xlu1 %3712  ;;  %3481 = vmatprep.mubr.msk.bf16.mxu1 %vm4543_vm6, %v3802_v1  ;;  %3485 = vmatprep.subr.bf16.mxu1 %v3802_v1  ;;  %v3728_v42 = vpop.permute.xlu0 %3727  ;;  %v1802_v59 = vsel %vm1798_vm9, %v3720_v40, %v3710_v32 }
 0x291   : > { %v3715_v28 = vunpack.i.h.bf16 %v3713_v25  ;;  %v3714_v29 = vunpack.i.l.bf16 %v3713_v25  ;;  %v1690_v35 = vsel %vm1687_vm8, %v3704_v46, %v3694_v21  ;;  %v3730_v56 = vunpack.i.h.bf16 %v3728_v42 }
 0x292   : > { %v1696_v37 = vpack.c.bf16 %v1691_v36, %v1690_v35  ;;  %v3729_v57 = vunpack.i.l.bf16 %v3728_v42  ;;  %v1807_v3 = vpack.c.bf16 %v1802_v59, %v1801_v58 }
 0x293   : > { %v1800_v34 = vsel %vm1798_vm9, %v3710_v32, %v3715_v28  ;;  %v1803_v60 = vsel %vm1798_vm9, %v3714_v29, %v3719_v41  ;;  %v1804_v61 = vsel %vm1798_vm9, %v3715_v28, %v3720_v40 }
 0x294   : > { %v4191_v31 = vpop.permute.xlu1 %3722  ;;  %v1809_v5 = vpack.c.bf16 %v1804_v61, %v1803_v60  ;;  %v3738_v6 = vpop.permute.xlu0 %3737 }
 0x295   : > { %3313 = vmatmul.mubr.msk.bf16.vlgmr.msra.gmra.mrb[20].mxu0 %vm1192_vm4, %v3312_v4  ;;  %3482 = vmatmul.mubr.msk.bf16.vlgmr.msra.gmra.mrb[20].mxu1 %vm1192_vm4, %v3312_v4  ;;  %v3725_v52 = vunpack.i.h.bf16 %v4191_v31  ;;  %v3724_v55 = vunpack.i.l.bf16 %v4191_v31  ;;  %v3740_v12 = vunpack.i.h.bf16 %v3738_v6  ;;  %v3739_v13 = vunpack.i.l.bf16 %v3738_v6 }
 0x296   : > { %1592 = vmatpush1.bf16.msra.mxu0 %v1585_v39  ;;  %3486 = vmatpush3.bf16.msra.mxu1 %v1587_v51  ;;  %v1692_v39 = vsel %vm1687_vm8, %v3699_v23, %v3704_v46  ;;  %v1799_v51 = vsel %vm1798_vm9, %v3709_v33, %v3714_v29 }
 0x297   : > { %1702 = vmatprep.subr.bf16.mxu0 %v1697_v27  ;;  %1623 = vmatprep.mubr.bf16.mxu0 %v3840_v48  ;;  %v1698_v38 = vpack.c.bf16 %v1693_v47, %v1692_v39  ;;  %v1808_v50 = vpack.c.bf16 %v1800_v34, %v1799_v51  ;;  %v1910_v63 = vsel %vm1909_vm10, %v3724_v55, %v3729_v57  ;;  %v3324_v27 = vld [vmem:[%s4533_s4 + $0x1c] sm:$0xf] }
 0x298   : > { %3487 = vmatprep.mubr.msk.bf16.mxu1 %vm4543_vm6, %v3802_v1  ;;  %3491 = vmatprep.subr.bf16.mxu1 %v3802_v1  ;;  %v3733_v45 = vpop.permute.xlu1 %3732  ;;  %v1911_v0 = vsel %vm1909_vm10, %v3725_v52, %v3730_v56  ;;  %v3748_v18 = vpop.permute.xlu0 %3747 }
 0x299   : > { %v3735_v7 = vunpack.i.h.bf16 %v3733_v45  ;;  %v3734_v8 = vunpack.i.l.bf16 %v3733_v45  ;;  %v1919_v9 = vpack.c.bf16 %v1911_v0, %v1910_v63  ;;  %v3750_v24 = vunpack.i.h.bf16 %v3748_v18 }
 0x29a   : > { %v3749_v25 = vunpack.i.l.bf16 %v3748_v18 }
 0x29b   : > { %v1912_v14 = vsel %vm1909_vm10, %v3734_v8, %v3724_v55  ;;  %v1913_v15 = vsel %vm1909_vm10, %v3735_v7, %v3725_v52  ;;  %v1914_v16 = vsel %vm1909_vm10, %v3729_v57, %v3734_v8  ;;  %v1915_v17 = vsel %vm1909_vm10, %v3730_v56, %v3735_v7 }
 0x29c   : > { %v3743_v2 = vpop.permute.xlu1 %3742  ;;  %v1918_v22 = vpack.c.bf16 %v1913_v15, %v1912_v14  ;;  %v1920_v23 = vpack.c.bf16 %v1915_v17, %v1914_v16  ;;  %v2023_v26 = vsel %vm2020_vm11, %v3749_v25, %v3739_v13  ;;  %v2024_v43 = vsel %vm2020_vm11, %v3750_v24, %v3740_v12 }
 0x29d   : > { %3316 = vmatmul.mubr.msk.bf16.vlgmr.msra.gmra.mrb[24].mxu0 %vm1192_vm4, %v3315_v49  ;;  %3488 = vmatmul.mubr.msk.bf16.vlgmr.msra.gmra.mrb[24].mxu1 %vm1192_vm4, %v3315_v49  ;;  %v3745_v10 = vunpack.i.h.bf16 %v3743_v2  ;;  %v3744_v11 = vunpack.i.l.bf16 %v3743_v2  ;;  %v2029_v28 = vpack.c.bf16 %v2024_v43, %v2023_v26 }
 0x29e   : > { %1703 = vmatpush1.bf16.msra.mxu0 %v1696_v37  ;;  %3492 = vmatpush3.bf16.msra.mxu1 %v1698_v38 }
 0x29f   : > { %1813 = vmatprep.subr.bf16.mxu0 %v1808_v50  ;;  %1734 = vmatprep.mubr.bf16.mxu0 %v3840_v48  ;;  %v2021_v20 = vsel %vm2020_vm11, %v3739_v13, %v3744_v11  ;;  %v2022_v21 = vsel %vm2020_vm11, %v3740_v12, %v3745_v10  ;;  %v2025_v44 = vsel %vm2020_vm11, %v3744_v11, %v3749_v25 }
 0x2a0   : > { %3493 = vmatprep.mubr.msk.bf16.mxu1 %vm4543_vm6, %v3802_v1  ;;  %3497 = vmatprep.subr.bf16.mxu1 %v3802_v1  ;;  %v2030_v4 = vpack.c.bf16 %v2022_v21, %v2021_v20  ;;  %v2026_v46 = vsel %vm2020_vm11, %v3745_v10, %v3750_v24 }
 0x2a1   : > { %v2031_v29 = vpack.c.bf16 %v2026_v46, %v2025_v44 }
 0x2a5   : > { %3319 = vmatmul.mubr.msk.bf16.vlgmr.msra.gmra.mrb[28].mxu0 %vm1192_vm4, %v3318_v62  ;;  %3494 = vmatmul.mubr.msk.bf16.vlgmr.msra.gmra.mrb[28].mxu1 %vm1192_vm4, %v3318_v62 }
 0x2a6   : > { %1814 = vmatpush1.bf16.msra.mxu0 %v1807_v3  ;;  %3498 = vmatpush3.bf16.msra.mxu1 %v1809_v5 }
 0x2a7   : > { %1924 = vmatprep.subr.bf16.mxu0 %v1919_v9  ;;  %1845 = vmatprep.mubr.bf16.mxu0 %v3840_v48 }
 0x2a8   : > { %3499 = vmatprep.mubr.msk.bf16.mxu1 %vm4543_vm6, %v3802_v1  ;;  %3503 = vmatprep.subr.bf16.mxu1 %v3802_v1 }
 0x2ad   : > { %3322 = vmatmul.mubr.msk.bf16.vlgmr.msra.gmra.mrb[32].mxu0 %vm1192_vm4, %v3321_v19  ;;  %3500 = vmatmul.mubr.msk.bf16.vlgmr.msra.gmra.mrb[32].mxu1 %vm1192_vm4, %v3321_v19 }
 0x2ae   : > { %1925 = vmatpush1.bf16.msra.mxu0 %v1918_v22  ;;  %3504 = vmatpush3.bf16.msra.mxu1 %v1920_v23 }
 0x2af   : > { %2035 = vmatprep.subr.bf16.mxu0 %v2030_v4  ;;  %1956 = vmatprep.mubr.bf16.mxu0 %v3840_v48 }
 0x2b0   : > { %3505 = vmatprep.mubr.msk.bf16.mxu1 %vm4543_vm6, %v3802_v1  ;;  %3509 = vmatprep.subr.bf16.mxu1 %v3802_v1 }
 0x2b5   : > { %3325 = vmatmul.mubr.msk.bf16.vlgmr.msra.gmra.mrb[36].mxu0 %vm1192_vm4, %v3324_v27  ;;  %3506 = vmatmul.mubr.msk.bf16.vlgmr.msra.gmra.mrb[36].mxu1 %vm1192_vm4, %v3324_v27 }
 0x2b6   : > { %2036 = vmatpush1.bf16.msra.mxu0 %v2029_v28  ;;  %3510 = vmatpush3.bf16.msra.mxu1 %v2031_v29 }
 0x2b7   : > { %2067 = vmatprep.mubr.bf16.mxu0 %v3840_v48  ;;  %3511 = vmatprep.mubr.msk.bf16.mxu1 %vm4543_vm6, %v3802_v1 }
 0x2b8   : > { %3515 = vmatprep.subr.bf16.mxu1 %v3802_v1 }
 0x2bd   : > { %3328 = vmatmul.mubr.msk.bf16.vlgmr.msra.gmra.mrb[40].mxu0 %vm1192_vm4, %v3327_v30  ;;  %3512 = vmatmul.mubr.msk.bf16.vlgmr.msra.gmra.mrb[40].mxu1 %vm1192_vm4, %v3327_v30 }
 0x2be   : > { %2222 = vmatprep.mubr.bf16.mxu0 %v3840_v48  ;;  %3517 = vmatprep.mubr.msk.bf16.mxu1 %vm4543_vm6, %v3802_v1 }
 0x350   : > { %v1230_v31 = vpop.f32.mrb[8].mxu0  ;;  %v1271_v32 = vpop.f32.mrb[8].mxu1 }
 0x351   : > { %v1232_v33 = vpop.f32.mrb[9].mxu0  ;;  %v3465_v35 = vpop.f32.mrb[9].mxu1 }
 0x352   : > { %v1234_v36 = vpop.f32.mrb[10].mxu0  ;;  %v1274_v39 = vpop.f32.mrb[10].mxu1 }
 0x353   : > { %v1235_v47 = vpop.f32.mrb[11].mxu0  ;;  %v3466_v49 = vpop.f32.mrb[11].mxu1 }
 0x358   : > { %v1314_v51 = vpop.f32.mrb[12].mxu0  ;;  %v1355_v34 = vpop.f32.mrb[12].mxu1 }
 0x359   : > { %v1315_v37 = vadd.f32 %v1314_v51, %v1230_v31  ;;  %v1356_v38 = vadd.f32 %v1355_v34, %v1271_v32  ;;  %v1316_v40 = vpop.f32.mrb[13].mxu0  ;;  %v3471_v41 = vpop.f32.mrb[13].mxu1 }
 0x35a   : > { %v1317_v42 = vadd.f32 %v1316_v40, %v1232_v33  ;;  %v1318_v45 = vpop.f32.mrb[14].mxu0  ;;  %v1358_v50 = vpop.f32.mrb[14].mxu1 }
 0x35b   : > { %v1319_v52 = vpop.f32.mrb[15].mxu0  ;;  %v3472_v55 = vpop.f32.mrb[15].mxu1 }
 0x360   : > { %v1422_v56 = vpop.f32.mrb[16].mxu0  ;;  %v1463_v57 = vpop.f32.mrb[16].mxu1 }
 0x361   : > { %v1469_v58 = vadd.f32 %v1422_v56, %v1315_v37  ;;  %v1471_v59 = vadd.f32 %v1463_v57, %v1356_v38  ;;  %v1424_v60 = vpop.f32.mrb[17].mxu0  ;;  %v3477_v61 = vpop.f32.mrb[17].mxu1 }
 0x362   : > { %v1470_v62 = vadd.f32 %v1424_v60, %v1317_v42  ;;  %v1426_v63 = vpop.f32.mrb[18].mxu0  ;;  %v1466_v0 = vpop.f32.mrb[18].mxu1 }
 0x363   : > { %v1427_v2 = vpop.f32.mrb[19].mxu0  ;;  %v3478_v3 = vpop.f32.mrb[19].mxu1 }
 0x364   : > { %v2122_v2 = vpop.permute.xlu1 %2121 }
 0x368   : > { %v1533_v5 = vpop.f32.mrb[20].mxu0  ;;  %v1574_v6 = vpop.f32.mrb[20].mxu1 }
 0x369   : > { %v1580_v7 = vadd.f32 %v1533_v5, %v1469_v58  ;;  %v1582_v8 = vadd.f32 %v1574_v6, %v1471_v59  ;;  %v1535_v9 = vpop.f32.mrb[21].mxu0  ;;  %v3483_v10 = vpop.f32.mrb[21].mxu1  ;;  %v1135_v6 = vld [vmem:[%s4532_s3] sm:$0x7] }
 0x36a   : > { %v1581_v11 = vadd.f32 %v1535_v9, %v1470_v62  ;;  %v1537_v12 = vpop.f32.mrb[22].mxu0  ;;  %v1577_v13 = vpop.f32.mrb[22].mxu1  ;;  %v2132_v62 = vshrl.u32 %v1155_v53, 7 }
 0x36b   : > { %v1538_v14 = vpop.f32.mrb[23].mxu0  ;;  %v3484_v15 = vpop.f32.mrb[23].mxu1 }
 0x36c   : > { %v2133_v63 = vsub.s32 0, %v2132_v62  ;;  %v2141_v0 = vsub.s32 2, %v2132_v62 }
 0x36e   : > { %v2134_v15 = vrot.slane %v1135_v6, %v2133_v63 }
 0x370   : > { %v1625_v16 = vpop.f32.mrb[24].mxu0  ;;  %v1666_v17 = vpop.f32.mrb[24].mxu1 }
 0x371   : > { %v1672_v18 = vadd.f32 %v1625_v16, %v1580_v7  ;;  %v1674_v19 = vadd.f32 %v1666_v17, %v1582_v8  ;;  %v1627_v20 = vpop.f32.mrb[25].mxu0  ;;  %v3489_v21 = vpop.f32.mrb[25].mxu1  ;;  %v2137_v7 = vsub.s32 1, %v2132_v62  ;;  %v2142_v16 = vrot.slane %v1135_v6, %v2141_v0 }
 0x372   : > { %v1673_v22 = vadd.f32 %v1627_v20, %v1581_v11  ;;  %v1629_v23 = vpop.f32.mrb[26].mxu0  ;;  %v1669_v24 = vpop.f32.mrb[26].mxu1 }
 0x373   : > { %v1630_v25 = vpop.f32.mrb[27].mxu0  ;;  %v3490_v4 = vpop.f32.mrb[27].mxu1  ;;  %v2138_v20 = vrot.slane %v1135_v6, %v2137_v7 }
 0x378   : > { %v1736_v26 = vpop.f32.mrb[28].mxu0  ;;  %v1777_v43 = vpop.f32.mrb[28].mxu1 }
 0x379   : > { %v1783_v44 = vadd.f32 %v1736_v26, %v1672_v18  ;;  %v1785_v46 = vadd.f32 %v1777_v43, %v1674_v19  ;;  %v1738_v27 = vpop.f32.mrb[29].mxu0  ;;  %v3495_v28 = vpop.f32.mrb[29].mxu1 }
 0x37a   : > { %v1784_v29 = vadd.f32 %v1738_v27, %v1673_v22  ;;  %v1740_v30 = vpop.f32.mrb[30].mxu0  ;;  %v1780_v31 = vpop.f32.mrb[30].mxu1 }
 0x37b   : > { %v1741_v32 = vpop.f32.mrb[31].mxu0  ;;  %v3496_v33 = vpop.f32.mrb[31].mxu1 }
 0x380   : > { %v1847_v35 = vpop.f32.mrb[32].mxu0  ;;  %v1888_v36 = vpop.f32.mrb[32].mxu1 }
 0x381   : > { %v1894_v39 = vadd.f32 %v1847_v35, %v1783_v44  ;;  %v1896_v47 = vadd.f32 %v1888_v36, %v1785_v46  ;;  %v1849_v49 = vpop.f32.mrb[33].mxu0  ;;  %v3501_v51 = vpop.f32.mrb[33].mxu1  ;;  %v2149_v44 = vld [vmem:[%s4536_s7] sm:$0xff] }
 0x382   : > { %v1895_v34 = vadd.f32 %v1849_v49, %v1784_v29  ;;  %v1851_v37 = vpop.f32.mrb[34].mxu0  ;;  %v1891_v38 = vpop.f32.mrb[34].mxu1 }
 0x383   : > { %v1852_v40 = vpop.f32.mrb[35].mxu0  ;;  %v3502_v41 = vpop.f32.mrb[35].mxu1 }
 0x384   : > { %v3330_v40 = vld [vmem:[%s4535_s6 + $0x4] sm:$0xf] }
 0x388   : > { %v1958_v42 = vpop.f32.mrb[36].mxu0  ;;  %v1999_v45 = vpop.f32.mrb[36].mxu1 }
 0x389   : > { %v2005_v50 = vadd.f32 %v1958_v42, %v1894_v39  ;;  %v2007_v52 = vadd.f32 %v1999_v45, %v1896_v47  ;;  %v1960_v55 = vpop.f32.mrb[37].mxu0  ;;  %v3507_v56 = vpop.f32.mrb[37].mxu1 }
 0x38a   : > { %v2006_v57 = vadd.f32 %v1960_v55, %v1895_v34  ;;  %v1962_v58 = vpop.f32.mrb[38].mxu0  ;;  %v2002_v59 = vpop.f32.mrb[38].mxu1 }
 0x38b   : > { %v1963_v60 = vpop.f32.mrb[39].mxu0  ;;  %v3508_v61 = vpop.f32.mrb[39].mxu1 }
 0x390   : > { %v2069_v3 = vpop.f32.mrb[40].mxu0  ;;  %v2110_v5 = vpop.f32.mrb[40].mxu1 }
 0x391   : > { %v2116_v8 = vadd.f32 %v2069_v3, %v2005_v50  ;;  %v2118_v9 = vadd.f32 %v2110_v5, %v2007_v52  ;;  %v2071_v10 = vpop.f32.mrb[41].mxu0  ;;  %v3513_v11 = vpop.f32.mrb[41].mxu1 }
 0x392   : > { %v2117_v12 = vadd.f32 %v2071_v10, %v2006_v57  ;;  %v2073_v13 = vpop.f32.mrb[42].mxu0  ;;  %v2113_v14 = vpop.f32.mrb[42].mxu1 }
 0x393   : > { %v2124_v53 = vadd.f32 %v2122_v2, %v2116_v8  ;;  %v2126_v17 = vadd.f32 %v2122_v2, %v2118_v9  ;;  %v2074_v18 = vpop.f32.mrb[43].mxu0  ;;  %v3514_v19 = vpop.f32.mrb[43].mxu1  ;;  %v2159_v9 = vld [vmem:[%s4535_s6] sm:$0xf] }
 0x394   : > { %v2125_v21 = vadd.f32 %v2122_v2, %v2117_v12 }
 0x395   : > { %v2127_v22 = vmax.f32 %v2124_v53, 0.0  ;;  %v2129_v23 = vmax.f32 %v2126_v17, 0.0  ;;  %v3337_v17 = vld [vmem:[%s4535_s6 + $0x8] sm:$0xf] }
 0x396   : > { %v2128_v24 = vmax.f32 %v2125_v21, 0.0 }
 0x397   : > { %v4294_v25 = vmul.f32 %v2134_v15, %v2127_v22  ;;  %v4296_v4 = vmul.f32 %v2142_v16, %v2129_v23 }
 0x398   : > { %v4298_v26 = vmul.f32 %v2138_v20, %v2128_v24 }
 0x399   : > { %2167 = vrot.lane.b32.xlu1 %v4296_v4, %s3839_s26  ;;  %v2586_v24 = vpack.c.bf16 %v4294_v25, %v4294_v25 }
 0x39a   : > { %v3752_v43 = vpack.i.bf16 %v4298_v26, %v4294_v25  ;;  %v2587_v21 = vpack.c.bf16 %v4298_v26, %v4298_v26 }
 0x39c   : > { %3753 = vrot.lane.b32.xlu0 %v3752_v43, %s3839_s26 }
 0x39d   : > { %2154 = vrot.lane.b32.xlu1 %v4296_v4, %s3812_s25 }
 0x3a0   : > { %3758 = vrot.lane.b32.xlu0 %v3752_v43, %s3812_s25 }
 0x3a1   : > { %2368 = vrot.lane.b32.xlu1 %v4296_v4, %s3829_s23 }
 0x3a4   : > { %3763 = vrot.lane.b32.xlu0 %v3752_v43, %s3829_s23 }
 0x3a5   : > { %2478 = vrot.lane.b32.xlu1 %v4296_v4, %s3841_s30 }
 0x3a8   : > { %3768 = vrot.lane.b32.xlu0 %v3752_v43, %s3841_s30 }
 0x3a9   : > { %2689 = vrot.lane.b32.xlu1 %v4296_v4, %s3827_s21 }
 0x3ac   : > { %3773 = vrot.lane.b32.xlu0 %v3752_v43, %s3827_s21  ;;  %s4496_s21 = scalar_lea.vmem %s4537_s8, %s3367_s15 }
 0x3ad   : > { %2799 = vrot.lane.b32.xlu1 %v4296_v4, %s3842_s17 }
 0x3b0   : > { %3778 = vrot.lane.b32.xlu0 %v3752_v43, %s3842_s17  ;;  %s3844_s17 = smov 105  }
 0x3b1   : > { %2909 = vrot.lane.b32.xlu1 %v4296_v4, %s3843_s18 }
 0x3b4   : > { %3783 = vrot.lane.b32.xlu0 %v3752_v43, %s3843_s18  ;;  %s3845_s18 = smov 103  }
 0x3b5   : > { %3019 = vrot.lane.b32.xlu1 %v4296_v4, %s3832_s9 }
 0x3b8   : > { %3788 = vrot.lane.b32.xlu0 %v3752_v43, %s3832_s9  ;;  %v2588_v43 = vpack.c.bf16 %v4296_v4, %v4296_v4 }
 0x3ba   : > { %v2599_v25 = vsel %vm2180_vm12, %v2588_v43, 0 }
 0x3bc   : > { %3127 = vperm.xlu0 %3792, %v2149_v44  }
 0x40b   : > { %v2168_v46 = vpop.permute.xlu1 %2167 }
 0x40e   : > { %v3754_v27 = vpop.permute.xlu0 %3753 }
 0x40f   : > { %v3756_v28 = vunpack.i.h.bf16 %v3754_v27  ;;  %v3755_v29 = vunpack.i.l.bf16 %v3754_v27  ;;  %v2155_v35 = vpop.permute.xlu1 %2154 }
 0x411   : > { %v2170_v30 = vsel %vm1180_vm0, %v3755_v29, %v3756_v28  ;;  %v2171_v31 = vsel %vm1180_vm0, %v2168_v46, %v3755_v29  ;;  %v2169_v32 = vsel %vm1180_vm0, %v3756_v28, %v2168_v46  ;;  %vm4549_vm0 = vmmov %vm4548_vm2  ;;  %v3341_v46 = vld [vmem:[%s4535_s6 + $0xc] sm:$0xf]  ;;  %v2593_v29 = vsel %vm2180_vm12, %v2586_v24, 0 }
 0x412   : > { %v2175_v33 = vpack.c.bf16 %v2170_v30, %v2170_v30  ;;  %v3759_v36 = vpop.permute.xlu0 %3758  ;;  %v2174_v39 = vpack.c.bf16 %v2171_v31, %v2171_v31  ;;  %v2176_v47 = vpack.c.bf16 %v2169_v32, %v2169_v32  ;;  %vm4551_vm4 = vmmov %vm4549_vm0 }
 0x413   : > { %v3761_v49 = vunpack.i.h.bf16 %v3759_v36  ;;  %v3760_v51 = vunpack.i.l.bf16 %v3759_v36  ;;  %v2369_v58 = vpop.permute.xlu1 %2368 }
 0x414   : > { %3331 = vmatprep.subr.msk.bf16.mxu0 %vm2180_vm12, %v2175_v33  ;;  %v2182_v34 = vsel %vm2180_vm12, %v2174_v39, 0  ;;  %v2188_v37 = vsel %vm2180_vm12, %v2176_v47, 0  ;;  %v3345_v47 = vld [vmem:[%s4535_s6 + $0x10] sm:$0xf] }
 0x415   : > { %v2157_v38 = vsel %vm1157_vm1, %v3760_v51, %v3761_v49  ;;  %2191 = vmatpush1.bf16.msra.mxu0 %v2182_v34  ;;  %3516 = vmatpush3.bf16.msra.mxu1 %v2188_v37  ;;  %v2158_v41 = vsel %vm1157_vm1, %v2155_v35, %v3760_v51  ;;  %v2156_v42 = vsel %vm1157_vm1, %v3761_v49, %v2155_v35  ;;  %vm4550_vm1 = vmmov %vm4549_vm0 }
 0x416   : > { %v2161_v45 = vpack.c.bf16 %v2157_v38, %v2157_v38  ;;  %v3764_v50 = vpop.permute.xlu0 %3763  ;;  %3521 = vmatprep.subr.bf16.mxu1 %v3802_v1  ;;  %v2160_v52 = vpack.c.bf16 %v2158_v41, %v2158_v41  ;;  %v2162_v55 = vpack.c.bf16 %v2156_v42, %v2156_v42 }
 0x417   : > { %v3766_v56 = vunpack.i.h.bf16 %v3764_v50  ;;  %v3765_v57 = vunpack.i.l.bf16 %v3764_v50  ;;  %v2479_v11 = vpop.permute.xlu1 %2478 }
 0x418   : > { %3332 = vmatmul.mubr.msk.bf16.vlgmr.msra.gmra.mrb[44].mxu0 %vm4544_vm13, %v3330_v40  ;;  %3518 = vmatmul.mubr.msk.bf16.vlgmr.msra.gmra.mrb[44].mxu1 %vm4545_vm14, %v3330_v40  ;;  %v2275_v59 = vsel %vm2180_vm12, %v2160_v52, 0  ;;  %v2281_v60 = vsel %vm2180_vm12, %v2162_v55, 0  ;;  %vm4557_vm13 = vmmov %vm4549_vm0 }
 0x419   : > { %v2371_v61 = vsel %vm1373_vm5, %v3765_v57, %v3766_v56  ;;  %3334 = vmatprep.subr.msk.bf16.mxu0 %vm2180_vm12, %v2161_v45  ;;  %3522 = vmatpush3.bf16.msra.mxu1 %v2281_v60  ;;  %v2372_v62 = vsel %vm1373_vm5, %v2369_v58, %v3765_v57  ;;  %v2370_v63 = vsel %vm1373_vm5, %v3766_v56, %v2369_v58  ;;  %vm4552_vm5 = vmmov %vm4549_vm0  ;;  %v3349_v56 = vld [vmem:[%s4535_s6 + $0x14] sm:$0xf] }
 0x41a   : > { %v2376_v0 = vpack.c.bf16 %v2371_v61, %v2371_v61  ;;  %2284 = vmatpush1.bf16.msra.mxu0 %v2275_v59  ;;  %v3769_v2 = vpop.permute.xlu0 %3768  ;;  %2315 = vmatprep.mubr.bf16.mxu0 %v3840_v48  ;;  %v2375_v6 = vpack.c.bf16 %v2372_v62, %v2372_v62  ;;  %v2377_v7 = vpack.c.bf16 %v2370_v63, %v2370_v63  ;;  %vm4558_vm14 = vmmov %vm4549_vm0 }
 0x41b   : > { %v3771_v3 = vunpack.i.h.bf16 %v3769_v2  ;;  %v3770_v5 = vunpack.i.l.bf16 %v3769_v2  ;;  %3523 = vmatprep.mubr.msk.bf16.mxu1 %vm4543_vm6, %v3802_v1  ;;  %3527 = vmatprep.subr.bf16.mxu1 %v3802_v1  ;;  %v2690_v23 = vpop.permute.xlu1 %2689 }
 0x41c   : > { %3338 = vmatprep.subr.msk.bf16.mxu0 %vm2180_vm12, %v2376_v0  ;;  %v2382_v12 = vsel %vm2180_vm12, %v2375_v6, 0  ;;  %v2388_v13 = vsel %vm2180_vm12, %v2377_v7, 0  ;;  %v3353_v7 = vld [vmem:[%s4535_s6 + $0x18] sm:$0xf] }
 0x41d   : > { %v2481_v8 = vsel %vm1484_vm7, %v3770_v5, %v3771_v3  ;;  %v2482_v14 = vsel %vm1484_vm7, %v2479_v11, %v3770_v5  ;;  %v2480_v15 = vsel %vm1484_vm7, %v3771_v3, %v2479_v11  ;;  %vm4553_vm7 = vmmov %vm4549_vm0 }
 0x41e   : > { %v2486_v10 = vpack.c.bf16 %v2481_v8, %v2481_v8  ;;  %v2485_v16 = vpack.c.bf16 %v2482_v14, %v2482_v14  ;;  %v2487_v53 = vpack.c.bf16 %v2480_v15, %v2480_v15  ;;  %v3774_v18 = vpop.permute.xlu0 %3773  ;;  %v3357_v15 = vld [vmem:[%s4535_s6 + $0x1c] sm:$0xf] }
 0x41f   : > { %v3776_v22 = vunpack.i.h.bf16 %v3774_v18  ;;  %v3775_v26 = vunpack.i.l.bf16 %v3774_v18  ;;  %v2800_v32 = vpop.permute.xlu1 %2799 }
 0x420   : > { %3335 = vmatmul.mubr.msk.bf16.vlgmr.msra.gmra.mrb[48].mxu0 %vm4546_vm15, %v2159_v9  ;;  %3524 = vmatmul.mubr.msk.bf16.vlgmr.msra.gmra.mrb[48].mxu1 %vm4547_vm3, %v2159_v9  ;;  %v2492_v19 = vsel %vm2180_vm12, %v2485_v16, 0  ;;  %v2498_v20 = vsel %vm2180_vm12, %v2487_v53, 0  ;;  %vm4559_vm15 = vmmov %vm4549_vm0  ;;  %v3361_v53 = vld [vmem:[%s4535_s6 + $0x20] sm:$0xf] }
 0x421   : > { %2391 = vmatpush1.bf16.msra.mxu0 %v2382_v12  ;;  %3528 = vmatpush3.bf16.msra.mxu1 %v2388_v13  ;;  %v2691_v44 = vsel %vm1687_vm8, %v3776_v22, %v2690_v23  ;;  %v2692_v4 = vsel %vm1687_vm8, %v3775_v26, %v3776_v22  ;;  %v2693_v31 = vsel %vm1687_vm8, %v2690_v23, %v3775_v26  ;;  %vm4554_vm8 = vmmov %vm4549_vm0 }
 0x422   : > { %3342 = vmatprep.subr.msk.bf16.mxu0 %vm2180_vm12, %v2486_v10  ;;  %2422 = vmatprep.mubr.bf16.mxu0 %v3840_v48  ;;  %v3779_v27 = vpop.permute.xlu0 %3778  ;;  %v2697_v28 = vpack.c.bf16 %v2691_v44, %v2691_v44  ;;  %v2696_v33 = vpack.c.bf16 %v2692_v4, %v2692_v4  ;;  %v2698_v35 = vpack.c.bf16 %v2693_v31, %v2693_v31  ;;  %vm4561_vm3 = vmmov %vm4549_vm0 }
 0x423   : > { %3529 = vmatprep.mubr.msk.bf16.mxu1 %vm4543_vm6, %v3802_v1  ;;  %3533 = vmatprep.subr.bf16.mxu1 %v3802_v1  ;;  %v3781_v30 = vunpack.i.h.bf16 %v3779_v27  ;;  %v3780_v36 = vunpack.i.l.bf16 %v3779_v27  ;;  %v2910_v42 = vpop.permute.xlu1 %2909 }
 0x424   : > { %v2703_v34 = vsel %vm2180_vm12, %v2696_v33, 0  ;;  %v2709_v37 = vsel %vm2180_vm12, %v2698_v35, 0 }
 0x425   : > { %v2801_v39 = vsel %vm1798_vm9, %v3781_v30, %v2800_v32  ;;  %v2802_v40 = vsel %vm1798_vm9, %v3780_v36, %v3781_v30  ;;  %v2803_v41 = vsel %vm1798_vm9, %v2800_v32, %v3780_v36  ;;  %vm4555_vm9 = vmmov %vm4549_vm0 }
 0x426   : > { %v3784_v49 = vpop.permute.xlu0 %3783  ;;  %v2807_v51 = vpack.c.bf16 %v2801_v39, %v2801_v39  ;;  %v2806_v45 = vpack.c.bf16 %v2802_v40, %v2802_v40  ;;  %v2808_v50 = vpack.c.bf16 %v2803_v41, %v2803_v41 }
 0x427   : > { %v3786_v38 = vunpack.i.h.bf16 %v3784_v49  ;;  %v3785_v52 = vunpack.i.l.bf16 %v3784_v49  ;;  %v3020_v0 = vpop.permute.xlu1 %3019 }
 0x428   : > { %3339 = vmatmul.mubr.msk.bf16.vlgmr.msra.gmra.mrb[52].mxu0 %vm4548_vm2, %v3337_v17  ;;  %3530 = vmatmul.mubr.msk.bf16.vlgmr.msra.gmra.mrb[52].mxu1 %vm4549_vm0, %v3337_v17  ;;  %v2813_v59 = vsel %vm2180_vm12, %v2806_v45, 0  ;;  %v2819_v60 = vsel %vm2180_vm12, %v2808_v50, 0  ;;  %vm3150_vm2 = vcmask 388352  }
 0x429   : > { %2501 = vmatpush1.bf16.msra.mxu0 %v2492_v19  ;;  %3534 = vmatpush3.bf16.msra.mxu1 %v2498_v20  ;;  %v2911_v55 = vsel %vm1909_vm10, %v3786_v38, %v2910_v42  ;;  %v2912_v62 = vsel %vm1909_vm10, %v3785_v52, %v3786_v38  ;;  %v2913_v63 = vsel %vm1909_vm10, %v2910_v42, %v3785_v52  ;;  %vm4556_vm10 = vmmov %vm4549_vm0 }
 0x42a   : > { %3346 = vmatprep.subr.msk.bf16.mxu0 %vm2180_vm12, %v2587_v21  ;;  %2532 = vmatprep.mubr.bf16.mxu0 %v3840_v48  ;;  %v3789_v57 = vpop.permute.xlu0 %3788  ;;  %v2917_v58 = vpack.c.bf16 %v2911_v55, %v2911_v55  ;;  %v2916_v2 = vpack.c.bf16 %v2912_v62, %v2912_v62  ;;  %v2918_v3 = vpack.c.bf16 %v2913_v63, %v2913_v63 }
 0x42b   : > { %3535 = vmatprep.mubr.msk.bf16.mxu1 %vm4543_vm6, %v3802_v1  ;;  %3539 = vmatprep.subr.bf16.mxu1 %v3802_v1  ;;  %v3791_v61 = vunpack.i.h.bf16 %v3789_v57  ;;  %v3790_v5 = vunpack.i.l.bf16 %v3789_v57 }
 0x42c   : > { %v2923_v9 = vsel %vm2180_vm12, %v2916_v2, 0  ;;  %v2929_v10 = vsel %vm2180_vm12, %v2918_v3, 0 }
 0x42d   : > { %v3021_v6 = vsel %vm2020_vm11, %v3791_v61, %v3020_v0  ;;  %v3022_v11 = vsel %vm2020_vm11, %v3790_v5, %v3791_v61  ;;  %v3023_v12 = vsel %vm2020_vm11, %v3020_v0, %v3790_v5  ;;  %vm4560_vm11 = vmmov %vm4549_vm0  ;;  %vm3155_vm0 = vcmask 519552  }
 0x42e   : > { %v3027_v8 = vpack.c.bf16 %v3021_v6, %v3021_v6  ;;  %v3026_v13 = vpack.c.bf16 %v3022_v11, %v3022_v11  ;;  %v3028_v14 = vpack.c.bf16 %v3023_v12, %v3023_v12 }
 0x430   : > { %3343 = vmatmul.mubr.msk.bf16.vlgmr.msra.gmra.mrb[56].mxu0 %vm4550_vm1, %v3341_v46  ;;  %3536 = vmatmul.mubr.msk.bf16.vlgmr.msra.gmra.mrb[56].mxu1 %vm4551_vm4, %v3341_v46  ;;  %v3033_v54 = vsel %vm2180_vm12, %v3026_v13, 0  ;;  %v3039_v16 = vsel %vm2180_vm12, %v3028_v14, 0  ;;  %vm3160_vm1 = vcmask 650752   ;;  %vm3165_vm4 = vcmask 781952  }
 0x431   : > { %2602 = vmatpush1.bf16.msra.mxu0 %v2593_v29  ;;  %3540 = vmatpush3.bf16.msra.mxu1 %v2599_v25 }
 0x432   : > { %3350 = vmatprep.subr.msk.bf16.mxu0 %vm2180_vm12, %v2697_v28  ;;  %2633 = vmatprep.mubr.bf16.mxu0 %v3840_v48 }
 0x433   : > { %3541 = vmatprep.mubr.msk.bf16.mxu1 %vm4543_vm6, %v3802_v1  ;;  %3545 = vmatprep.subr.bf16.mxu1 %v3802_v1 }
 0x438   : > { %3347 = vmatmul.mubr.msk.bf16.vlgmr.msra.gmra.mrb[60].mxu0 %vm4552_vm5, %v3345_v47  ;;  %3542 = vmatmul.mubr.msk.bf16.vlgmr.msra.gmra.mrb[60].mxu1 %vm4553_vm7, %v3345_v47  ;;  %vm3172_vm5 = vcmask 793600   ;;  %vm3175_vm7 = vcmask 913152  }
 0x439   : > { %2712 = vmatpush1.bf16.msra.mxu0 %v2703_v34  ;;  %3546 = vmatpush3.bf16.msra.mxu1 %v2709_v37 }
 0x43a   : > { %3354 = vmatprep.subr.msk.bf16.mxu0 %vm2180_vm12, %v2807_v51  ;;  %2743 = vmatprep.mubr.bf16.mxu0 %v3840_v48 }
 0x43b   : > { %3547 = vmatprep.mubr.msk.bf16.mxu1 %vm4543_vm6, %v3802_v1  ;;  %3551 = vmatprep.subr.bf16.mxu1 %v3802_v1 }
 0x440   : > { %3351 = vmatmul.mubr.msk.bf16.vlgmr.msra.gmra.mrb[64].mxu0 %vm4554_vm8, %v3349_v56  ;;  %3548 = vmatmul.mubr.msk.bf16.vlgmr.msra.gmra.mrb[64].mxu1 %vm4555_vm9, %v3349_v56  ;;  %vm3180_vm8 = vcmask 1044352   ;;  %vm3207_vm9 = vcmask 678912  }
 0x441   : > { %2822 = vmatpush1.bf16.msra.mxu0 %v2813_v59  ;;  %3552 = vmatpush3.bf16.msra.mxu1 %v2819_v60 }
 0x442   : > { %3358 = vmatprep.subr.msk.bf16.mxu0 %vm2180_vm12, %v2917_v58  ;;  %2853 = vmatprep.mubr.bf16.mxu0 %v3840_v48 }
 0x443   : > { %3553 = vmatprep.mubr.msk.bf16.mxu1 %vm4543_vm6, %v3802_v1  ;;  %3557 = vmatprep.subr.bf16.mxu1 %v3802_v1 }
 0x448   : > { %3355 = vmatmul.mubr.msk.bf16.vlgmr.msra.gmra.mrb[68].mxu0 %vm4556_vm10, %v3353_v7  ;;  %3554 = vmatmul.mubr.msk.bf16.vlgmr.msra.gmra.mrb[68].mxu1 %vm4557_vm13, %v3353_v7 }
 0x449   : > { %2932 = vmatpush1.bf16.msra.mxu0 %v2923_v9  ;;  %3558 = vmatpush3.bf16.msra.mxu1 %v2929_v10 }
 0x44a   : > { %3362 = vmatprep.subr.msk.bf16.mxu0 %vm2180_vm12, %v3027_v8  ;;  %2963 = vmatprep.mubr.bf16.mxu0 %v3840_v48  ;;  %vm3145_vm12 = vcmask 257152  }
 0x44b   : > { %3559 = vmatprep.mubr.msk.bf16.mxu1 %vm4543_vm6, %v3802_v1  ;;  %3563 = vmatprep.subr.bf16.mxu1 %v3802_v1 }
 0x450   : > { %3359 = vmatmul.mubr.msk.bf16.vlgmr.msra.gmra.mrb[72].mxu0 %vm4558_vm14, %v3357_v15  ;;  %3560 = vmatmul.mubr.msk.bf16.vlgmr.msra.gmra.mrb[72].mxu1 %vm4559_vm15, %v3357_v15 }
 0x451   : > { %3042 = vmatpush1.bf16.msra.mxu0 %v3033_v54  ;;  %3564 = vmatpush3.bf16.msra.mxu1 %v3039_v16 }
 0x452   : > { %3073 = vmatprep.mubr.bf16.mxu0 %v3840_v48  ;;  %3565 = vmatprep.mubr.msk.bf16.mxu1 %vm4543_vm6, %v3802_v1  ;;  %vm3140_vm6 = vcmask 125952  }
 0x458   : > { %3363 = vmatmul.mubr.msk.bf16.vlgmr.msra.gmra.mrb[76].mxu0 %vm4560_vm11, %v3361_v53  ;;  %3566 = vmatmul.mubr.msk.bf16.vlgmr.msra.gmra.mrb[76].mxu1 %vm4561_vm3, %v3361_v53 }
 0x4eb   : > { %v2224_v17 = vpop.f32.mrb[44].mxu0  ;;  %v2265_v18 = vpop.f32.mrb[44].mxu1 }
 0x4ec   : > { %v2226_v19 = vpop.f32.mrb[45].mxu0  ;;  %v3519_v20 = vpop.f32.mrb[45].mxu1 }
 0x4ed   : > { %v2228_v21 = vpop.f32.mrb[46].mxu0  ;;  %v2268_v22 = vpop.f32.mrb[46].mxu1 }
 0x4ee   : > { %v2229_v23 = vpop.f32.mrb[47].mxu0  ;;  %v3520_v24 = vpop.f32.mrb[47].mxu1 }
 0x4f3   : > { %v2317_v48 = vpop.f32.mrb[48].mxu0  ;;  %v2358_v43 = vpop.f32.mrb[48].mxu1 }
 0x4f4   : > { %v2318_v26 = vadd.f32 %v2317_v48, %v2224_v17  ;;  %v2319_v1 = vpop.f32.mrb[49].mxu0  ;;  %v2359_v44 = vadd.f32 %v2358_v43, %v2265_v18  ;;  %v3525_v46 = vpop.f32.mrb[49].mxu1 }
 0x4f5   : > { %v2320_v27 = vadd.f32 %v2319_v1, %v2226_v19  ;;  %v2321_v28 = vpop.f32.mrb[50].mxu0  ;;  %v2361_v29 = vpop.f32.mrb[50].mxu1 }
 0x4f6   : > { %v2322_v25 = vpop.f32.mrb[51].mxu0  ;;  %v3526_v30 = vpop.f32.mrb[51].mxu1 }
 0x4fb   : > { %v2424_v4 = vpop.f32.mrb[52].mxu0  ;;  %v2465_v31 = vpop.f32.mrb[52].mxu1 }
 0x4fc   : > { %v2471_v32 = vadd.f32 %v2424_v4, %v2318_v26  ;;  %v2473_v33 = vadd.f32 %v2465_v31, %v2359_v44  ;;  %v2426_v35 = vpop.f32.mrb[53].mxu0  ;;  %v3531_v36 = vpop.f32.mrb[53].mxu1 }
 0x4fd   : > { %v2472_v39 = vadd.f32 %v2426_v35, %v2320_v27  ;;  %v2428_v47 = vpop.f32.mrb[54].mxu0  ;;  %v2468_v49 = vpop.f32.mrb[54].mxu1 }
 0x4fe   : > { %v2429_v51 = vpop.f32.mrb[55].mxu0  ;;  %v3532_v34 = vpop.f32.mrb[55].mxu1 }
 0x503   : > { %v2534_v37 = vpop.f32.mrb[56].mxu0  ;;  %v2575_v38 = vpop.f32.mrb[56].mxu1 }
 0x504   : > { %v2581_v40 = vadd.f32 %v2534_v37, %v2471_v32  ;;  %v2583_v41 = vadd.f32 %v2575_v38, %v2473_v33  ;;  %v2536_v42 = vpop.f32.mrb[57].mxu0  ;;  %v3537_v45 = vpop.f32.mrb[57].mxu1 }
 0x505   : > { %v2582_v50 = vadd.f32 %v2536_v42, %v2472_v39  ;;  %v2538_v52 = vpop.f32.mrb[58].mxu0  ;;  %v2578_v55 = vpop.f32.mrb[58].mxu1 }
 0x506   : > { %v2539_v56 = vpop.f32.mrb[59].mxu0  ;;  %v3538_v57 = vpop.f32.mrb[59].mxu1 }
 0x507   : > { %v3128_v32 = vpop.permute.xlu0 %3127 }
 0x50b   : > { %v2635_v58 = vpop.f32.mrb[60].mxu0  ;;  %v2676_v59 = vpop.f32.mrb[60].mxu1 }
 0x50c   : > { %v2682_v60 = vadd.f32 %v2635_v58, %v2581_v40  ;;  %v2684_v61 = vadd.f32 %v2676_v59, %v2583_v41  ;;  %v2637_v62 = vpop.f32.mrb[61].mxu0  ;;  %v3543_v63 = vpop.f32.mrb[61].mxu1 }
 0x50d   : > { %v2683_v0 = vadd.f32 %v2637_v62, %v2582_v50  ;;  %v2639_v2 = vpop.f32.mrb[62].mxu0  ;;  %v2679_v3 = vpop.f32.mrb[62].mxu1 }
 0x50e   : > { %v2640_v5 = vpop.f32.mrb[63].mxu0  ;;  %v3544_v6 = vpop.f32.mrb[63].mxu1 }
 0x513   : > { %v2745_v7 = vpop.f32.mrb[64].mxu0  ;;  %v2786_v8 = vpop.f32.mrb[64].mxu1 }
 0x514   : > { %v2792_v9 = vadd.f32 %v2745_v7, %v2682_v60  ;;  %v2794_v10 = vadd.f32 %v2786_v8, %v2684_v61  ;;  %v2747_v11 = vpop.f32.mrb[65].mxu0  ;;  %v3549_v12 = vpop.f32.mrb[65].mxu1 }
 0x515   : > { %v2793_v13 = vadd.f32 %v2747_v11, %v2683_v0  ;;  %v2749_v14 = vpop.f32.mrb[66].mxu0  ;;  %v2789_v15 = vpop.f32.mrb[66].mxu1 }
 0x516   : > { %v2750_v54 = vpop.f32.mrb[67].mxu0  ;;  %v3550_v16 = vpop.f32.mrb[67].mxu1 }
 0x51b   : > { %v2855_v53 = vpop.f32.mrb[68].mxu0  ;;  %v2896_v17 = vpop.f32.mrb[68].mxu1 }
 0x51c   : > { %v2902_v18 = vadd.f32 %v2855_v53, %v2792_v9  ;;  %v2904_v19 = vadd.f32 %v2896_v17, %v2794_v10  ;;  %v2857_v20 = vpop.f32.mrb[69].mxu0  ;;  %v3555_v21 = vpop.f32.mrb[69].mxu1 }
 0x51d   : > { %v2903_v22 = vadd.f32 %v2857_v20, %v2793_v13  ;;  %v2859_v23 = vpop.f32.mrb[70].mxu0  ;;  %v2899_v24 = vpop.f32.mrb[70].mxu1 }
 0x51e   : > { %v2860_v48 = vpop.f32.mrb[71].mxu0  ;;  %v3556_v43 = vpop.f32.mrb[71].mxu1 }
 0x523   : > { %v2965_v26 = vpop.f32.mrb[72].mxu0  ;;  %v3006_v1 = vpop.f32.mrb[72].mxu1 }
 0x524   : > { %v3012_v44 = vadd.f32 %v2965_v26, %v2902_v18  ;;  %v3014_v46 = vadd.f32 %v3006_v1, %v2904_v19  ;;  %v2967_v27 = vpop.f32.mrb[73].mxu0  ;;  %v3561_v28 = vpop.f32.mrb[73].mxu1 }
 0x525   : > { %v3013_v29 = vadd.f32 %v2967_v27, %v2903_v22  ;;  %v2969_v25 = vpop.f32.mrb[74].mxu0  ;;  %v3009_v30 = vpop.f32.mrb[74].mxu1 }
 0x526   : > { %v2970_v4 = vpop.f32.mrb[75].mxu0  ;;  %v3562_v31 = vpop.f32.mrb[75].mxu1 }
 0x52b   : > { %v3075_v33 = vpop.f32.mrb[76].mxu0  ;;  %v3116_v35 = vpop.f32.mrb[76].mxu1 }
 0x52c   : > { %v3122_v36 = vadd.f32 %v3075_v33, %v3012_v44  ;;  %v3124_v39 = vadd.f32 %v3116_v35, %v3014_v46  ;;  %v3077_v47 = vpop.f32.mrb[77].mxu0  ;;  %v3567_v49 = vpop.f32.mrb[77].mxu1 }
 0x52d   : > { %v3123_v51 = vadd.f32 %v3077_v47, %v3013_v29  ;;  %v3079_v34 = vpop.f32.mrb[78].mxu0  ;;  %v3119_v37 = vpop.f32.mrb[78].mxu1 }
 0x52e   : > { %v3130_v38 = vadd.f32 %v3128_v32, %v3122_v36  ;;  %v3132_v40 = vadd.f32 %v3128_v32, %v3124_v39  ;;  %v3080_v41 = vpop.f32.mrb[79].mxu0  ;;  %v3568_v42 = vpop.f32.mrb[79].mxu1 }
 0x52f   : > { %v3131_v45 = vadd.f32 %v3128_v32, %v3123_v51 }
 0x530   : > { %v3133_v50 = vmax.f32 %v3130_v38, 0.0  ;;  %v3135_v52 = vmax.f32 %v3132_v40, 0.0 }
 0x531   : > { %v3134_v55 = vmax.f32 %v3131_v45, 0.0 }
 0x532   : > { %3142 = vrot.lane.b32.xlu0 %v3133_v50, %s3831_s29  ;;  %3137 = vrot.lane.b32.xlu1 %v3133_v50, %s3832_s9  ;;  %s3850_s29 = smov 83   ;;  %s3851_s9 = smov 97  }
 0x533   : > { %v3203_v56 = vcombine.low %v3134_v55, %v3135_v52  ;;  %v3168_v57 = vcombine.low %v3133_v50, %v3134_v55 }
 0x536   : > { %3147 = vrot.lane.b32.xlu0 %v3133_v50, %s3844_s17  ;;  %3152 = vrot.lane.b32.xlu1 %v3133_v50, %s3845_s18 }
 0x53a   : > { %3157 = vrot.lane.b32.xlu0 %v3133_v50, %s3846_s14  ;;  %3211 = vrot.lane.b32.xlu1 %v3135_v52, %s3847_s16 }
 0x53e   : > { %3162 = vrot.lane.b32.xlu0 %v3133_v50, %s3848_s19  ;;  %3182 = vrot.lane.b32.xlu1 %v3134_v55, %s3849_s20 }
 0x542   : > { %3186 = vrot.lane.b32.xlu1 %v3134_v55, %s3830_s24  ;;  %3204 = vrot.lane.b32.xlu0 %v3203_v56, %s3850_s29 }
 0x546   : > { %3190 = vrot.lane.b32.xlu1 %v3134_v55, %s3836_s13  ;;  %3169 = vrot.lane.b32.xlu0 %v3168_v57, %s3851_s9 }
 0x54a   : > { %3194 = vrot.lane.b32.xlu1 %v3134_v55, %s3852_s22  ;;  %3177 = vrot.lane.b32.xlu0 %v3134_v55, %s3853_s10 }
 0x54e   : > { %3198 = vrot.lane.b32.xlu1 %v3134_v55, %s3854_s11 }
 0x552   : > { %3215 = vrot.lane.b32.xlu1 %v3135_v52, %s3855_s12 }
 0x5a4   : > { %v3143_v58 = vpop.permute.xlu0 %3142  ;;  %v3138_v59 = vpop.permute.xlu1 %3137 }
 0x5a5   : > { %3141 = vst.msk [vmem:[%s4496_s21] sm:$0xf] %vm3140_vm6, %v3138_v59 }
 0x5a6   : > { %3146 = vst.msk [vmem:[%s4496_s21] sm:$0xf] %vm3145_vm12, %v3143_v58 }
 0x5a8   : > { %v3148_v60 = vpop.permute.xlu0 %3147  ;;  %v3153_v61 = vpop.permute.xlu1 %3152 }
 0x5a9   : > { %3151 = vst.msk [vmem:[%s4496_s21] sm:$0xf] %vm3150_vm2, %v3148_v60 }
 0x5aa   : > { %3156 = vst.msk [vmem:[%s4496_s21] sm:$0xf] %vm3155_vm0, %v3153_v61 }
 0x5ac   : > { %v3158_v62 = vpop.permute.xlu0 %3157  ;;  %v3212_v63 = vpop.permute.xlu1 %3211 }
 0x5ad   : > { %3161 = vst.msk [vmem:[%s4496_s21] sm:$0xf] %vm3160_vm1, %v3158_v62 }
 0x5b0   : > { %v3163_v0 = vpop.permute.xlu0 %3162  ;;  %v3183_v2 = vpop.permute.xlu1 %3182 }
 0x5b1   : > { %3166 = vst.msk [vmem:[%s4496_s21] sm:$0xf] %vm3165_vm4, %v3163_v0 }
 0x5b2   : > { %3185 = vst.msk [vmem:[%s4496_s21 + $0x4] sm:$0xf] %vm3140_vm6, %v3183_v2 }
 0x5b4   : > { %v3187_v3 = vpop.permute.xlu1 %3186  ;;  %v3205_v5 = vpop.permute.xlu0 %3204 }
 0x5b5   : > { %3189 = vst.msk [vmem:[%s4496_s21 + $0x4] sm:$0xf] %vm3145_vm12, %v3187_v3  ;;  %v3206_v12 = vrot.slane %v3205_v5, 4 }
 0x5b7   : > { %v3208_v14 = vsel %vm3207_vm9, %v3205_v5, %v3206_v12 }
 0x5b8   : > { %v3191_v6 = vpop.permute.xlu1 %3190  ;;  %v3170_v7 = vpop.permute.xlu0 %3169 }
 0x5b9   : > { %3193 = vst.msk [vmem:[%s4496_s21 + $0x4] sm:$0xf] %vm3150_vm2, %v3191_v6  ;;  %v3171_v8 = vrot.slane %v3170_v7, 4 }
 0x5bb   : > { %v3173_v9 = vsel %vm3172_vm5, %v3170_v7, %v3171_v8 }
 0x5bc   : > { %3176 = vst.msk [vmem:[%s4496_s21] sm:$0xf] %vm3175_vm7, %v3173_v9  ;;  %v3195_v10 = vpop.permute.xlu1 %3194  ;;  %v3178_v11 = vpop.permute.xlu0 %3177 }
 0x5bd   : > { %3197 = vst.msk [vmem:[%s4496_s21 + $0x4] sm:$0xf] %vm3155_vm0, %v3195_v10 }
 0x5be   : > { %3181 = vst.msk [vmem:[%s4496_s21] sm:$0xf] %vm3180_vm8, %v3178_v11 }
 0x5c0   : > { %v3199_v13 = vpop.permute.xlu1 %3198 }
 0x5c1   : > { %3201 = vst.msk [vmem:[%s4496_s21 + $0x4] sm:$0xf] %vm3160_vm1, %v3199_v13 }
 0x5c2   : > { %3210 = vst.msk [vmem:[%s4496_s21 + $0x4] sm:$0xf] %vm3165_vm4, %v3208_v14 }
 0x5c3   : > { %3214 = vst.msk [vmem:[%s4496_s21 + $0x4] sm:$0xf] %vm3175_vm7, %v3212_v63 }
 0x5c4   : > { %v3216_v15 = vpop.permute.xlu1 %3215 }
 0x5c5   : > { %3218 = vst.msk [vmem:[%s4496_s21 + $0x4] sm:$0xf] %vm3180_vm8, %v3216_v15 }
 0x5c6 PF: > { %s18_s27 = sadd.s32 1, %s3800_s27  }
 0x5c7   : > { %p15_p4 = scmp.ge.s32.totalorder %s18_s27, 4  }
 0x5c9   :  { %17 = sbr.rel (!%p15_p4) target bundleno = 1 (0x1), region = 101 }

</bundles_post_ra>
